<compile_context>
chip_gen: v7x
topology: tpu7x:2x2x1
jax: 0.10.0
libtpu: 0.0.40
codegen_flags: <defaults>
</compile_context>

<pallas_src>
import functools
import math

import jax
import jax.numpy as jnp
from jax.experimental import pallas as pl
from jax.experimental.pallas import tpu as pltpu


def _round_up(x, m):
    return (x + m - 1) // m * m


def _pad2d(a, rows, cols):
    r, c = a.shape
    if r == rows and c == cols:
        return a
    return jnp.pad(a, ((0, rows - r), (0, cols - c)))


def _tile(dim, align, cap):
    """Pick (padded_dim, tile) with tile % align == 0 and buffering well under VMEM."""
    p = _round_up(dim, align)
    if p <= cap:
        return p, p
    return _round_up(dim, cap), cap


# ----------------------------------------------------------------------------
# Tiled Pallas matmul + bias (+ReLU):  out = relu?(x @ w + b)
#   bf16 MXU operands, f32 VMEM accumulator, K-axis reduction innermost.
# ----------------------------------------------------------------------------
def _mm_bias_kernel(x_ref, w_ref, b_ref, o_ref, acc_ref, *, relu):
    @pl.when(pl.program_id(2) == 0)
    def _():
        acc_ref[...] = jnp.zeros_like(acc_ref)

    acc_ref[...] += jnp.dot(x_ref[...], w_ref[...],
                            preferred_element_type=jnp.float32)

    @pl.when(pl.program_id(2) == pl.num_programs(2) - 1)
    def _():
        out = acc_ref[...] + b_ref[...]
        if relu:
            out = jnp.maximum(out, 0.0)
        o_ref[...] = out.astype(o_ref.dtype)


def matmul_bias(x, w, b, relu=False):
    """x: (M, K), w: (K, N), b: (N,) -> (M, N) f32, computed on the MXU in bf16/f32."""
    M, K = x.shape
    K2, N = w.shape
    assert K == K2

    # Sublane-align M (8), lane-align N/K (128); caps keep (2 inputs x 2 buffers x tile)
    # + accumulator around ~5 MiB -> portable to v7x's smaller VMEM / 32 MiB scoped default.
    Mp, tm = _tile(M, 8, 512)
    Np, tn = _tile(N, 128, 512)
    Kp, tk = _tile(K, 128, 512)

    xp = _pad2d(x, Mp, Kp).astype(jnp.bfloat16)
    wp = _pad2d(w, Kp, Np).astype(jnp.bfloat16)
    bp = _pad2d(b.reshape(1, N).astype(jnp.float32), 1, Np)

    grid = (Mp // tm, Np // tn, Kp // tk)
    kern = functools.partial(_mm_bias_kernel, relu=relu)
    out = pl.pallas_call(
        kern,
        out_shape=jax.ShapeDtypeStruct((Mp, Np), jnp.float32),
        grid_spec=pltpu.PrefetchScalarGridSpec(
            num_scalar_prefetch=0,
            grid=grid,
            in_specs=[
                pl.BlockSpec((tm, tk), lambda i, j, k: (i, k)),
                pl.BlockSpec((tk, tn), lambda i, j, k: (k, j)),
                pl.BlockSpec((1, tn), lambda i, j, k: (0, j)),
            ],
            out_specs=pl.BlockSpec((tm, tn), lambda i, j, k: (i, j)),
            scratch_shapes=[pltpu.VMEM((tm, tn), jnp.float32)],
        ),
        compiler_params=pltpu.CompilerParams(
            dimension_semantics=("parallel", "parallel", "arbitrary"),
            vmem_limit_bytes=32 * 1024 * 1024,
        ),
        cost_estimate=pl.CostEstimate(
            flops=2 * Mp * Np * Kp,
            transcendentals=0,
            bytes_accessed=2 * (Mp * Kp + Kp * Np) + 4 * (Np + Mp * Np),
        ),
    )(xp, wp, bp)
    return out[:M, :N]


# ----------------------------------------------------------------------------
# Conv2d (valid padding, square stride) in NHWC: im2col (transpose-free) + Pallas matmul
# ----------------------------------------------------------------------------
def conv2d_relu_nhwc(x, w_mat, b, kh, kw, stride, relu=True):
    """x: (N, H, W, C); w_mat: (KH*KW*C, OC) with (kh, kw, c) row order; b: (OC,)."""
    N, H, W, C = x.shape
    OC = w_mat.shape[1]
    OH = (H - kh) // stride + 1
    OW = (W - kw) // stride + 1

    # NHWC im2col: strided window slices keep channels on the fast (lane) axis and need
    # no transposes.  Plain-JAX glue; cheap at these sizes.
    # TODO(synk): fuse the patch extraction into the Pallas pipeline (strided in-kernel
    # reads) to avoid materializing the patches tensor in HBM at large batch/spatial sizes.
    cols = []
    for i in range(kh):
        for j in range(kw):
            cols.append(jax.lax.slice(
                x,
                (0, i, j, 0),
                (N, i + stride * (OH - 1) + 1, j + stride * (OW - 1) + 1, C),
                (1, stride, stride, 1)))
    patches = jnp.stack(cols, axis=3)                       # (N, OH, OW, KH*KW, C)
    patches = patches.reshape(N * OH * OW, kh * kw * C)     # features: (kh, kw, c), c fastest

    out = matmul_bias(patches, w_mat, b, relu=relu)         # Pallas tiled MXU matmul
    return out.reshape(N, OH, OW, OC)


# ----------------------------------------------------------------------------
# Fused fc1 -> ReLU -> fc2 -> ReLU -> fc3 in a single pallas_call
# (weights resident in VMEM, intermediates never touch HBM)
# ----------------------------------------------------------------------------
def _fc_fused_kernel(x_ref, w1_ref, b1_ref, w2_ref, b2_ref, w3_ref, b3_ref, o_ref):
    h = jnp.dot(x_ref[...], w1_ref[...], preferred_element_type=jnp.float32)
    h = jnp.maximum(h + b1_ref[...], 0.0)
    # TODO(synk): Dropout(0.1) omitted (identity in eval mode); no stochastic mask here.
    h = jnp.dot(h.astype(w2_ref.dtype), w2_ref[...], preferred_element_type=jnp.float32)
    h = jnp.maximum(h + b2_ref[...], 0.0)
    out = jnp.dot(h.astype(w3_ref.dtype), w3_ref[...], preferred_element_type=jnp.float32)
    out = out + b3_ref[...]
    o_ref[...] = out.astype(o_ref.dtype)


def fc_fused(flat, fc):
    """flat: (B, K1) f32.  fc dict holds (in, out)-oriented bf16 weights, f32 biases,
    fc3 already lane-padded to a multiple of 128."""
    B, K1 = flat.shape
    w1, b1, w2, b2, w3, b3 = fc["w1"], fc["b1"], fc["w2"], fc["b2"], fc["w3"], fc["b3"]
    n_actions = fc["n_actions"]
    assert K1 == w1.shape[0]
    H1, H2, N3 = w1.shape[1], w2.shape[1], w3.shape[1]

    Bp = _round_up(B, 8)
    tb = min(Bp, 256)
    Bp = _round_up(Bp, tb)
    xp = _pad2d(flat, Bp, K1).astype(jnp.bfloat16)

    out = pl.pallas_call(
        _fc_fused_kernel,
        out_shape=jax.ShapeDtypeStruct((Bp, N3), jnp.float32),
        grid_spec=pltpu.PrefetchScalarGridSpec(
            num_scalar_prefetch=0,
            grid=(Bp // tb,),
            in_specs=[
                pl.BlockSpec((tb, K1), lambda i: (i, 0)),
                pl.BlockSpec((K1, H1), lambda i: (0, 0)),
                pl.BlockSpec((1, H1), lambda i: (0, 0)),
                pl.BlockSpec((H1, H2), lambda i: (0, 0)),
                pl.BlockSpec((1, H2), lambda i: (0, 0)),
                pl.BlockSpec((H2, N3), lambda i: (0, 0)),
                pl.BlockSpec((1, N3), lambda i: (0, 0)),
            ],
            out_specs=pl.BlockSpec((tb, N3), lambda i: (i, 0)),
        ),
        compiler_params=pltpu.CompilerParams(
            dimension_semantics=("parallel",),
            vmem_limit_bytes=32 * 1024 * 1024,
        ),
        cost_estimate=pl.CostEstimate(
            flops=2 * Bp * (K1 * H1 + H1 * H2 + H2 * N3),
            transcendentals=0,
            bytes_accessed=2 * (Bp * K1 + K1 * H1 + H1 * H2 + H2 * N3) + 4 * Bp * N3,
        ),
    )(xp, w1, b1.reshape(1, H1), w2, b2.reshape(1, H2), w3, b3.reshape(1, N3))
    return out[:B, :n_actions]


# ----------------------------------------------------------------------------
# Parameter construction (PyTorch-layout, deterministic fan-in scaled uniform)
# ----------------------------------------------------------------------------
def _init_conv(key, out_c, in_c, kh, kw):
    k1, k2 = jax.random.split(key)
    bound = 1.0 / math.sqrt(in_c * kh * kw)
    w = jax.random.uniform(k1, (out_c, in_c, kh, kw), jnp.float32, -bound, bound)
    b = jax.random.uniform(k2, (out_c,), jnp.float32, -bound, bound)
    return w, b


def _init_linear(key, out_f, in_f):
    k1, k2 = jax.random.split(key)
    bound = 1.0 / math.sqrt(in_f)
    w = jax.random.uniform(k1, (out_f, in_f), jnp.float32, -bound, bound)
    b = jax.random.uniform(k2, (out_f,), jnp.float32, -bound, bound)
    return w, b


def _conv_out_hw(h, w):
    def out_sz(s, k, st):
        return (s - k) // st + 1
    oh = out_sz(out_sz(out_sz(out_sz(h, 8, 4), 4, 2), 3, 1), 3, 1)
    ow = out_sz(out_sz(out_sz(out_sz(w, 8, 4), 4, 2), 3, 1), 3, 1)
    return oh, ow


def init_dqn_params(key, input_shape, n_actions):
    c_in, h, w = input_shape
    keys = jax.random.split(key, 7)
    params = {
        "c1": _init_conv(keys[0], 32, c_in, 8, 8),
        "c2": _init_conv(keys[1], 64, 32, 4, 4),
        "c3": _init_conv(keys[2], 64, 64, 3, 3),
        "c4": _init_conv(keys[3], 128, 64, 3, 3),
    }
    oh, ow = _conv_out_hw(h, w)
    conv_out_size = 128 * oh * ow
    params["fc1"] = _init_linear(keys[4], 512, conv_out_size)
    params["fc2"] = _init_linear(keys[5], 256, 512)
    params["fc3"] = _init_linear(keys[6], n_actions, 256)
    return params


def prepare_params(params, input_shape, n_actions):
    """One-time repack into kernel-friendly layouts:
       conv weights (OC,C,KH,KW) -> (KH*KW*C, OC) matching NHWC im2col row order,
       fc weights transposed to (in, out) with fc1 columns permuted for NHWC flatten,
       fc3 output zero-padded to a lane-dense multiple of 128, matmul operands in bf16."""
    _, h, w = input_shape
    oh, ow = _conv_out_hw(h, w)

    packed = {}
    for name, stride in (("c1", 4), ("c2", 2), ("c3", 1), ("c4", 1)):
        wc, bc = params[name]
        oc, ic, kh, kw = wc.shape
        w_mat = wc.transpose(2, 3, 1, 0).reshape(kh * kw * ic, oc)   # rows: (kh, kw, c)
        packed[name] = dict(w=w_mat.astype(jnp.bfloat16), b=bc,
                            kh=kh, kw=kw, stride=stride)

    w1, b1 = params["fc1"]
    # Permute fc1 input columns from torch's NCHW flatten (c, oh, ow) to NHWC (oh, ow, c).
    w1 = w1.reshape(512, 128, oh, ow).transpose(0, 2, 3, 1).reshape(512, 128 * oh * ow)
    w2, b2 = params["fc2"]
    w3, b3 = params["fc3"]
    n_pad = _round_up(n_actions, 128)
    w3t = jnp.zeros((256, n_pad), jnp.float32).at[:, :n_actions].set(w3.T)
    b3p = jnp.zeros((n_pad,), jnp.float32).at[:n_actions].set(b3)

    packed["fc"] = dict(
        w1=w1.T.astype(jnp.bfloat16), b1=b1,
        w2=w2.T.astype(jnp.bfloat16), b2=b2,
        w3=w3t.astype(jnp.bfloat16), b3=b3p,
        n_actions=n_actions,
    )
    return packed


# ----------------------------------------------------------------------------
# Forward pass (matches DQN.forward, eval mode)
# ----------------------------------------------------------------------------
def dqn_forward(packed, x_nchw):
    x = jnp.transpose(x_nchw, (0, 2, 3, 1))      # single NCHW -> NHWC at the boundary
    h = x
    for name in ("c1", "c2", "c3", "c4"):
        cfg = packed[name]
        h = conv2d_relu_nhwc(h, cfg["w"], cfg["b"], cfg["kh"], cfg["kw"],
                             cfg["stride"], relu=True)
    flat = h.reshape(x.shape[0], -1)             # NHWC flatten (fc1 columns pre-permuted)
    return fc_fused(flat, packed["fc"])


if __name__ == "__main__":
    key = jax.random.PRNGKey(0)
    k_param, k_x = jax.random.split(key)

    # Smallest spatial size valid for this conv stack: 52 -> 12 -> 5 -> 3 -> 1.
    batch = 2
    input_shape = (4, 52, 52)
    n_actions = 6

    params = init_dqn_params(k_param, input_shape, n_actions)
    packed = prepare_params(params, input_shape, n_actions)
    x = jax.random.normal(k_x, (batch,) + input_shape, dtype=jnp.float32)

    fwd = jax.jit(functools.partial(dqn_forward, packed))
    q_values = jax.block_until_ready(fwd(x))

    assert q_values.shape == (batch, n_actions), q_values.shape
    assert q_values.dtype == jnp.float32
    print("KERNEL_OK")
</pallas_src>

<mosaic_0001>
module attributes {stable_mosaic.version = 11 : i64} {
  func.func @_mm_bias_kernel(%arg0: i32, %arg1: i32, %arg2: i32, %arg3: memref<288x256xbf16, #tpu.memory_space<vmem>>, %arg4: memref<256x128xbf16, #tpu.memory_space<vmem>>, %arg5: memref<1x128xf32, #tpu.memory_space<vmem>>, %arg6: memref<288x128xf32, #tpu.memory_space<vmem>>, %arg7: memref<288x128xf32, #tpu.memory_space<vmem>>) attributes {dimension_semantics = [#tpu.dimension_semantics<parallel>, #tpu.dimension_semantics<parallel>, #tpu.dimension_semantics<arbitrary>], iteration_bounds = array<i64: 1, 1, 1>, scalar_prefetch = 0 : i64, scratch_operands = 1 : i64, tpu.core_type = #tpu.core_type<tc>, window_params = [{transform_indices = @transform_0, window_bounds = array<i64: 288, 256>}, {transform_indices = @transform_1, window_bounds = array<i64: 256, 128>}, {transform_indices = @transform_2, window_bounds = array<i64: 1, 128>}, {transform_indices = @transform_3, window_bounds = array<i64: 288, 128>}]} {
    %c0_i32 = arith.constant 0 : i32
    %0 = arith.cmpi eq, %arg2, %c0_i32 : i32
    %1 = arith.extui %0 : i1 to i32
    %c0_i32_0 = arith.constant 0 : i32
    %2 = arith.cmpi ne, %1, %c0_i32_0 : i32
    scf.if %2 {
      %cst_10 = arith.constant 0.000000e+00 : f32
      %12 = vector.broadcast %cst_10 : f32 to vector<288x128xf32>
      %c0_11 = arith.constant 0 : index
      %c0_12 = arith.constant 0 : index
      %13 = vector.load %arg7[%c0_11, %c0_12] : memref<288x128xf32, #tpu.memory_space<vmem>>, vector<288x128xf32>
      tpu.vector_store %arg7[%c0_11, %c0_12], %12 {strides = array<i32>} : memref<288x128xf32, #tpu.memory_space<vmem>>, vector<288x128xf32>,
    } else {
    }
    %c0 = arith.constant 0 : index
    %c0_1 = arith.constant 0 : index
    %3 = vector.load %arg7[%c0, %c0_1] : memref<288x128xf32, #tpu.memory_space<vmem>>, vector<288x128xf32>
    %c0_2 = arith.constant 0 : index
    %c0_3 = arith.constant 0 : index
    %4 = vector.load %arg3[%c0_2, %c0_3] : memref<288x256xbf16, #tpu.memory_space<vmem>>, vector<288x256xbf16>
    %c0_4 = arith.constant 0 : index
    %c0_5 = arith.constant 0 : index
    %5 = vector.load %arg4[%c0_4, %c0_5] : memref<256x128xbf16, #tpu.memory_space<vmem>>, vector<256x128xbf16>
    %cst = arith.constant dense<0.000000e+00> : vector<288x128xf32>
    %6 = tpu.matmul %4, %5, %cst {dimension_numbers = #tpu.dot_dimension_numbers<[1], [0], [0], [1], [0, 0, 1, 1], [], []>} : vector<288x256xbf16>, vector<256x128xbf16>, vector<288x128xf32> -> vector<288x128xf32>
    %7 = arith.addf %3, %6 : vector<288x128xf32>
    %c0_6 = arith.constant 0 : index
    %c0_7 = arith.constant 0 : index
    %8 = vector.load %arg7[%c0_6, %c0_7] : memref<288x128xf32, #tpu.memory_space<vmem>>, vector<288x128xf32>
    tpu.vector_store %arg7[%c0_6, %c0_7], %7 {strides = array<i32>} : memref<288x128xf32, #tpu.memory_space<vmem>>, vector<288x128xf32>,
    %c0_i32_8 = arith.constant 0 : i32
    %9 = arith.cmpi eq, %arg2, %c0_i32_8 : i32
    %10 = arith.extui %9 : i1 to i32
    %c0_i32_9 = arith.constant 0 : i32
    %11 = arith.cmpi ne, %10, %c0_i32_9 : i32
    scf.if %11 {
      %c0_10 = arith.constant 0 : index
      %c0_11 = arith.constant 0 : index
      %12 = vector.load %arg7[%c0_10, %c0_11] : memref<288x128xf32, #tpu.memory_space<vmem>>, vector<288x128xf32>
      %c0_12 = arith.constant 0 : index
      %c0_13 = arith.constant 0 : index
      %13 = vector.load %arg5[%c0_12, %c0_13] : memref<1x128xf32, #tpu.memory_space<vmem>>, vector<1x128xf32>
      %14 = vector.broadcast %13 : vector<1x128xf32> to vector<288x128xf32>
      %15 = arith.addf %12, %14 : vector<288x128xf32>
      %cst_14 = arith.constant 0.000000e+00 : f32
      %16 = vector.broadcast %cst_14 : f32 to vector<288x128xf32>
      %17 = arith.maximumf %15, %16 : vector<288x128xf32>
      %c0_15 = arith.constant 0 : index
      %c0_16 = arith.constant 0 : index
      %18 = vector.load %arg6[%c0_15, %c0_16] : memref<288x128xf32, #tpu.memory_space<vmem>>, vector<288x128xf32>
      tpu.vector_store %arg6[%c0_15, %c0_16], %17 {strides = array<i32>} : memref<288x128xf32, #tpu.memory_space<vmem>>, vector<288x128xf32>,
    } else {
    }
    return
  }
  func.func @transform_0(%arg0: i32, %arg1: i32, %arg2: i32) -> (i32, i32) {
    %c0_i32 = arith.constant 0 : i32
    return %arg0, %arg2 : i32, i32
  }
  func.func @transform_1(%arg0: i32, %arg1: i32, %arg2: i32) -> (i32, i32) {
    %c0_i32 = arith.constant 0 : i32
    return %arg2, %arg1 : i32, i32
  }
  func.func @transform_2(%arg0: i32, %arg1: i32, %arg2: i32) -> (i32, i32) {
    %c0_i32 = arith.constant 0 : i32
    %c0_i32_0 = arith.constant 0 : i32
    return %c0_i32, %arg1 : i32, i32
  }
  func.func @transform_3(%arg0: i32, %arg1: i32, %arg2: i32) -> (i32, i32) {
    %c0_i32 = arith.constant 0 : i32
    return %arg0, %arg1 : i32, i32
  }
}

module attributes {stable_mosaic.version = 11 : i64} {
  func.func @_mm_bias_kernel(%arg0: i32, %arg1: i32, %arg2: i32, %arg3: memref<56x512xbf16, #tpu.memory_space<vmem>>, %arg4: memref<512x128xbf16, #tpu.memory_space<vmem>>, %arg5: memref<1x128xf32, #tpu.memory_space<vmem>>, %arg6: memref<56x128xf32, #tpu.memory_space<vmem>>, %arg7: memref<56x128xf32, #tpu.memory_space<vmem>>) attributes {dimension_semantics = [#tpu.dimension_semantics<parallel>, #tpu.dimension_semantics<parallel>, #tpu.dimension_semantics<arbitrary>], iteration_bounds = array<i64: 1, 1, 1>, scalar_prefetch = 0 : i64, scratch_operands = 1 : i64, tpu.core_type = #tpu.core_type<tc>, window_params = [{transform_indices = @transform_0, window_bounds = array<i64: 56, 512>}, {transform_indices = @transform_1, window_bounds = array<i64: 512, 128>}, {transform_indices = @transform_2, window_bounds = array<i64: 1, 128>}, {transform_indices = @transform_3, window_bounds = array<i64: 56, 128>}]} {
    %c0_i32 = arith.constant 0 : i32
    %0 = arith.cmpi eq, %arg2, %c0_i32 : i32
    %1 = arith.extui %0 : i1 to i32
    %c0_i32_0 = arith.constant 0 : i32
    %2 = arith.cmpi ne, %1, %c0_i32_0 : i32
    scf.if %2 {
      %cst_10 = arith.constant 0.000000e+00 : f32
      %12 = vector.broadcast %cst_10 : f32 to vector<56x128xf32>
      %c0_11 = arith.constant 0 : index
      %c0_12 = arith.constant 0 : index
      %13 = vector.load %arg7[%c0_11, %c0_12] : memref<56x128xf32, #tpu.memory_space<vmem>>, vector<56x128xf32>
      tpu.vector_store %arg7[%c0_11, %c0_12], %12 {strides = array<i32>} : memref<56x128xf32, #tpu.memory_space<vmem>>, vector<56x128xf32>,
    } else {
    }
    %c0 = arith.constant 0 : index
    %c0_1 = arith.constant 0 : index
    %3 = vector.load %arg7[%c0, %c0_1] : memref<56x128xf32, #tpu.memory_space<vmem>>, vector<56x128xf32>
    %c0_2 = arith.constant 0 : index
    %c0_3 = arith.constant 0 : index
    %4 = vector.load %arg3[%c0_2, %c0_3] : memref<56x512xbf16, #tpu.memory_space<vmem>>, vector<56x512xbf16>
    %c0_4 = arith.constant 0 : index
    %c0_5 = arith.constant 0 : index
    %5 = vector.load %arg4[%c0_4, %c0_5] : memref<512x128xbf16, #tpu.memory_space<vmem>>, vector<512x128xbf16>
    %cst = arith.constant dense<0.000000e+00> : vector<56x128xf32>
    %6 = tpu.matmul %4, %5, %cst {dimension_numbers = #tpu.dot_dimension_numbers<[1], [0], [0], [1], [0, 0, 1, 1], [], []>} : vector<56x512xbf16>, vector<512x128xbf16>, vector<56x128xf32> -> vector<56x128xf32>
    %7 = arith.addf %3, %6 : vector<56x128xf32>
    %c0_6 = arith.constant 0 : index
    %c0_7 = arith.constant 0 : index
    %8 = vector.load %arg7[%c0_6, %c0_7] : memref<56x128xf32, #tpu.memory_space<vmem>>, vector<56x128xf32>
    tpu.vector_store %arg7[%c0_6, %c0_7], %7 {strides = array<i32>} : memref<56x128xf32, #tpu.memory_space<vmem>>, vector<56x128xf32>,
    %c0_i32_8 = arith.constant 0 : i32
    %9 = arith.cmpi eq, %arg2, %c0_i32_8 : i32
    %10 = arith.extui %9 : i1 to i32
    %c0_i32_9 = arith.constant 0 : i32
    %11 = arith.cmpi ne, %10, %c0_i32_9 : i32
    scf.if %11 {
      %c0_10 = arith.constant 0 : index
      %c0_11 = arith.constant 0 : index
      %12 = vector.load %arg7[%c0_10, %c0_11] : memref<56x128xf32, #tpu.memory_space<vmem>>, vector<56x128xf32>
      %c0_12 = arith.constant 0 : index
      %c0_13 = arith.constant 0 : index
      %13 = vector.load %arg5[%c0_12, %c0_13] : memref<1x128xf32, #tpu.memory_space<vmem>>, vector<1x128xf32>
      %14 = vector.broadcast %13 : vector<1x128xf32> to vector<56x128xf32>
      %15 = arith.addf %12, %14 : vector<56x128xf32>
      %cst_14 = arith.constant 0.000000e+00 : f32
      %16 = vector.broadcast %cst_14 : f32 to vector<56x128xf32>
      %17 = arith.maximumf %15, %16 : vector<56x128xf32>
      %c0_15 = arith.constant 0 : index
      %c0_16 = arith.constant 0 : index
      %18 = vector.load %arg6[%c0_15, %c0_16] : memref<56x128xf32, #tpu.memory_space<vmem>>, vector<56x128xf32>
      tpu.vector_store %arg6[%c0_15, %c0_16], %17 {strides = array<i32>} : memref<56x128xf32, #tpu.memory_space<vmem>>, vector<56x128xf32>,
    } else {
    }
    return
  }
  func.func @transform_0(%arg0: i32, %arg1: i32, %arg2: i32) -> (i32, i32) {
    %c0_i32 = arith.constant 0 : i32
    return %arg0, %arg2 : i32, i32
  }
  func.func @transform_1(%arg0: i32, %arg1: i32, %arg2: i32) -> (i32, i32) {
    %c0_i32 = arith.constant 0 : i32
    return %arg2, %arg1 : i32, i32
  }
  func.func @transform_2(%arg0: i32, %arg1: i32, %arg2: i32) -> (i32, i32) {
    %c0_i32 = arith.constant 0 : i32
    %c0_i32_0 = arith.constant 0 : i32
    return %c0_i32, %arg1 : i32, i32
  }
  func.func @transform_3(%arg0: i32, %arg1: i32, %arg2: i32) -> (i32, i32) {
    %c0_i32 = arith.constant 0 : i32
    return %arg0, %arg1 : i32, i32
  }
}

module attributes {stable_mosaic.version = 11 : i64} {
  func.func @_mm_bias_kernel(%arg0: i32, %arg1: i32, %arg2: i32, %arg3: memref<24x512xbf16, #tpu.memory_space<vmem>>, %arg4: memref<512x128xbf16, #tpu.memory_space<vmem>>, %arg5: memref<1x128xf32, #tpu.memory_space<vmem>>, %arg6: memref<24x128xf32, #tpu.memory_space<vmem>>, %arg7: memref<24x128xf32, #tpu.memory_space<vmem>>) attributes {dimension_semantics = [#tpu.dimension_semantics<parallel>, #tpu.dimension_semantics<parallel>, #tpu.dimension_semantics<arbitrary>], iteration_bounds = array<i64: 1, 1, 2>, scalar_prefetch = 0 : i64, scratch_operands = 1 : i64, tpu.core_type = #tpu.core_type<tc>, window_params = [{transform_indices = @transform_0, window_bounds = array<i64: 24, 512>}, {transform_indices = @transform_1, window_bounds = array<i64: 512, 128>}, {transform_indices = @transform_2, window_bounds = array<i64: 1, 128>}, {transform_indices = @transform_3, window_bounds = array<i64: 24, 128>}]} {
    %c0_i32 = arith.constant 0 : i32
    %0 = arith.cmpi eq, %arg2, %c0_i32 : i32
    %1 = arith.extui %0 : i1 to i32
    %c0_i32_0 = arith.constant 0 : i32
    %2 = arith.cmpi ne, %1, %c0_i32_0 : i32
    scf.if %2 {
      %cst_9 = arith.constant 0.000000e+00 : f32
      %12 = vector.broadcast %cst_9 : f32 to vector<24x128xf32>
      %c0_10 = arith.constant 0 : index
      %c0_11 = arith.constant 0 : index
      %13 = vector.load %arg7[%c0_10, %c0_11] : memref<24x128xf32, #tpu.memory_space<vmem>>, vector<24x128xf32>
      tpu.vector_store %arg7[%c0_10, %c0_11], %12 {strides = array<i32>} : memref<24x128xf32, #tpu.memory_space<vmem>>, vector<24x128xf32>,
    } else {
    }
    %c0 = arith.constant 0 : index
    %c0_1 = arith.constant 0 : index
    %3 = vector.load %arg7[%c0, %c0_1] : memref<24x128xf32, #tpu.memory_space<vmem>>, vector<24x128xf32>
    %c0_2 = arith.constant 0 : index
    %c0_3 = arith.constant 0 : index
    %4 = vector.load %arg3[%c0_2, %c0_3] : memref<24x512xbf16, #tpu.memory_space<vmem>>, vector<24x512xbf16>
    %c0_4 = arith.constant 0 : index
    %c0_5 = arith.constant 0 : index
    %5 = vector.load %arg4[%c0_4, %c0_5] : memref<512x128xbf16, #tpu.memory_space<vmem>>, vector<512x128xbf16>
    %cst = arith.constant dense<0.000000e+00> : vector<24x128xf32>
    %6 = tpu.matmul %4, %5, %cst {dimension_numbers = #tpu.dot_dimension_numbers<[1], [0], [0], [1], [0, 0, 1, 1], [], []>} : vector<24x512xbf16>, vector<512x128xbf16>, vector<24x128xf32> -> vector<24x128xf32>
    %7 = arith.addf %3, %6 : vector<24x128xf32>
    %c0_6 = arith.constant 0 : index
    %c0_7 = arith.constant 0 : index
    %8 = vector.load %arg7[%c0_6, %c0_7] : memref<24x128xf32, #tpu.memory_space<vmem>>, vector<24x128xf32>
    tpu.vector_store %arg7[%c0_6, %c0_7], %7 {strides = array<i32>} : memref<24x128xf32, #tpu.memory_space<vmem>>, vector<24x128xf32>,
    %c1_i32 = arith.constant 1 : i32
    %9 = arith.cmpi eq, %arg2, %c1_i32 : i32
    %10 = arith.extui %9 : i1 to i32
    %c0_i32_8 = arith.constant 0 : i32
    %11 = arith.cmpi ne, %10, %c0_i32_8 : i32
    scf.if %11 {
      %c0_9 = arith.constant 0 : index
      %c0_10 = arith.constant 0 : index
      %12 = vector.load %arg7[%c0_9, %c0_10] : memref<24x128xf32, #tpu.memory_space<vmem>>, vector<24x128xf32>
      %c0_11 = arith.constant 0 : index
      %c0_12 = arith.constant 0 : index
      %13 = vector.load %arg5[%c0_11, %c0_12] : memref<1x128xf32, #tpu.memory_space<vmem>>, vector<1x128xf32>
      %14 = vector.broadcast %13 : vector<1x128xf32> to vector<24x128xf32>
      %15 = arith.addf %12, %14 : vector<24x128xf32>
      %cst_13 = arith.constant 0.000000e+00 : f32
      %16 = vector.broadcast %cst_13 : f32 to vector<24x128xf32>
      %17 = arith.maximumf %15, %16 : vector<24x128xf32>
      %c0_14 = arith.constant 0 : index
      %c0_15 = arith.constant 0 : index
      %18 = vector.load %arg6[%c0_14, %c0_15] : memref<24x128xf32, #tpu.memory_space<vmem>>, vector<24x128xf32>
      tpu.vector_store %arg6[%c0_14, %c0_15], %17 {strides = array<i32>} : memref<24x128xf32, #tpu.memory_space<vmem>>, vector<24x128xf32>,
    } else {
    }
    return
  }
  func.func @transform_0(%arg0: i32, %arg1: i32, %arg2: i32) -> (i32, i32) {
    %c0_i32 = arith.constant 0 : i32
    return %arg0, %arg2 : i32, i32
  }
  func.func @transform_1(%arg0: i32, %arg1: i32, %arg2: i32) -> (i32, i32) {
    %c0_i32 = arith.constant 0 : i32
    return %arg2, %arg1 : i32, i32
  }
  func.func @transform_2(%arg0: i32, %arg1: i32, %arg2: i32) -> (i32, i32) {
    %c0_i32 = arith.constant 0 : i32
    %c0_i32_0 = arith.constant 0 : i32
    return %c0_i32, %arg1 : i32, i32
  }
  func.func @transform_3(%arg0: i32, %arg1: i32, %arg2: i32) -> (i32, i32) {
    %c0_i32 = arith.constant 0 : i32
    return %arg0, %arg1 : i32, i32
  }
}

module attributes {stable_mosaic.version = 11 : i64} {
  func.func @_mm_bias_kernel(%arg0: i32, %arg1: i32, %arg2: i32, %arg3: memref<8x512xbf16, #tpu.memory_space<vmem>>, %arg4: memref<512x128xbf16, #tpu.memory_space<vmem>>, %arg5: memref<1x128xf32, #tpu.memory_space<vmem>>, %arg6: memref<8x128xf32, #tpu.memory_space<vmem>>, %arg7: memref<8x128xf32, #tpu.memory_space<vmem>>) attributes {dimension_semantics = [#tpu.dimension_semantics<parallel>, #tpu.dimension_semantics<parallel>, #tpu.dimension_semantics<arbitrary>], iteration_bounds = array<i64: 1, 1, 2>, scalar_prefetch = 0 : i64, scratch_operands = 1 : i64, tpu.core_type = #tpu.core_type<tc>, window_params = [{transform_indices = @transform_0, window_bounds = array<i64: 8, 512>}, {transform_indices = @transform_1, window_bounds = array<i64: 512, 128>}, {transform_indices = @transform_2, window_bounds = array<i64: 1, 128>}, {transform_indices = @transform_3, window_bounds = array<i64: 8, 128>}]} {
    %c0_i32 = arith.constant 0 : i32
    %0 = arith.cmpi eq, %arg2, %c0_i32 : i32
    %1 = arith.extui %0 : i1 to i32
    %c0_i32_0 = arith.constant 0 : i32
    %2 = arith.cmpi ne, %1, %c0_i32_0 : i32
    scf.if %2 {
      %cst_9 = arith.constant 0.000000e+00 : f32
      %12 = vector.broadcast %cst_9 : f32 to vector<8x128xf32>
      %c0_10 = arith.constant 0 : index
      %c0_11 = arith.constant 0 : index
      %13 = vector.load %arg7[%c0_10, %c0_11] : memref<8x128xf32, #tpu.memory_space<vmem>>, vector<8x128xf32>
      tpu.vector_store %arg7[%c0_10, %c0_11], %12 {strides = array<i32>} : memref<8x128xf32, #tpu.memory_space<vmem>>, vector<8x128xf32>,
    } else {
    }
    %c0 = arith.constant 0 : index
    %c0_1 = arith.constant 0 : index
    %3 = vector.load %arg7[%c0, %c0_1] : memref<8x128xf32, #tpu.memory_space<vmem>>, vector<8x128xf32>
    %c0_2 = arith.constant 0 : index
    %c0_3 = arith.constant 0 : index
    %4 = vector.load %arg3[%c0_2, %c0_3] : memref<8x512xbf16, #tpu.memory_space<vmem>>, vector<8x512xbf16>
    %c0_4 = arith.constant 0 : index
    %c0_5 = arith.constant 0 : index
    %5 = vector.load %arg4[%c0_4, %c0_5] : memref<512x128xbf16, #tpu.memory_space<vmem>>, vector<512x128xbf16>
    %cst = arith.constant dense<0.000000e+00> : vector<8x128xf32>
    %6 = tpu.matmul %4, %5, %cst {dimension_numbers = #tpu.dot_dimension_numbers<[1], [0], [0], [1], [0, 0, 1, 1], [], []>} : vector<8x512xbf16>, vector<512x128xbf16>, vector<8x128xf32> -> vector<8x128xf32>
    %7 = arith.addf %3, %6 : vector<8x128xf32>
    %c0_6 = arith.constant 0 : index
    %c0_7 = arith.constant 0 : index
    %8 = vector.load %arg7[%c0_6, %c0_7] : memref<8x128xf32, #tpu.memory_space<vmem>>, vector<8x128xf32>
    tpu.vector_store %arg7[%c0_6, %c0_7], %7 {strides = array<i32>} : memref<8x128xf32, #tpu.memory_space<vmem>>, vector<8x128xf32>,
    %c1_i32 = arith.constant 1 : i32
    %9 = arith.cmpi eq, %arg2, %c1_i32 : i32
    %10 = arith.extui %9 : i1 to i32
    %c0_i32_8 = arith.constant 0 : i32
    %11 = arith.cmpi ne, %10, %c0_i32_8 : i32
    scf.if %11 {
      %c0_9 = arith.constant 0 : index
      %c0_10 = arith.constant 0 : index
      %12 = vector.load %arg7[%c0_9, %c0_10] : memref<8x128xf32, #tpu.memory_space<vmem>>, vector<8x128xf32>
      %c0_11 = arith.constant 0 : index
      %c0_12 = arith.constant 0 : index
      %13 = vector.load %arg5[%c0_11, %c0_12] : memref<1x128xf32, #tpu.memory_space<vmem>>, vector<1x128xf32>
      %14 = vector.broadcast %13 : vector<1x128xf32> to vector<8x128xf32>
      %15 = arith.addf %12, %14 : vector<8x128xf32>
      %cst_13 = arith.constant 0.000000e+00 : f32
      %16 = vector.broadcast %cst_13 : f32 to vector<8x128xf32>
      %17 = arith.maximumf %15, %16 : vector<8x128xf32>
      %c0_14 = arith.constant 0 : index
      %c0_15 = arith.constant 0 : index
      %18 = vector.load %arg6[%c0_14, %c0_15] : memref<8x128xf32, #tpu.memory_space<vmem>>, vector<8x128xf32>
      tpu.vector_store %arg6[%c0_14, %c0_15], %17 {strides = array<i32>} : memref<8x128xf32, #tpu.memory_space<vmem>>, vector<8x128xf32>,
    } else {
    }
    return
  }
  func.func @transform_0(%arg0: i32, %arg1: i32, %arg2: i32) -> (i32, i32) {
    %c0_i32 = arith.constant 0 : i32
    return %arg0, %arg2 : i32, i32
  }
  func.func @transform_1(%arg0: i32, %arg1: i32, %arg2: i32) -> (i32, i32) {
    %c0_i32 = arith.constant 0 : i32
    return %arg2, %arg1 : i32, i32
  }
  func.func @transform_2(%arg0: i32, %arg1: i32, %arg2: i32) -> (i32, i32) {
    %c0_i32 = arith.constant 0 : i32
    %c0_i32_0 = arith.constant 0 : i32
    return %c0_i32, %arg1 : i32, i32
  }
  func.func @transform_3(%arg0: i32, %arg1: i32, %arg2: i32) -> (i32, i32) {
    %c0_i32 = arith.constant 0 : i32
    return %arg0, %arg1 : i32, i32
  }
}

module attributes {stable_mosaic.version = 11 : i64} {
  func.func @_fc_fused_kernel(%arg0: i32, %arg1: memref<8x128xbf16, #tpu.memory_space<vmem>>, %arg2: memref<128x512xbf16, #tpu.memory_space<vmem>>, %arg3: memref<1x512xf32, #tpu.memory_space<vmem>>, %arg4: memref<512x256xbf16, #tpu.memory_space<vmem>>, %arg5: memref<1x256xf32, #tpu.memory_space<vmem>>, %arg6: memref<256x128xbf16, #tpu.memory_space<vmem>>, %arg7: memref<1x128xf32, #tpu.memory_space<vmem>>, %arg8: memref<8x128xf32, #tpu.memory_space<vmem>>) attributes {dimension_semantics = [#tpu.dimension_semantics<parallel>], iteration_bounds = array<i64: 1>, scalar_prefetch = 0 : i64, scratch_operands = 0 : i64, tpu.core_type = #tpu.core_type<tc>, window_params = [{transform_indices = @transform_0, window_bounds = array<i64: 8, 128>}, {pipeline_mode = #tpu.pipeline_mode<synchronous>, transform_indices = @transform_1, window_bounds = array<i64: 128, 512>}, {pipeline_mode = #tpu.pipeline_mode<synchronous>, transform_indices = @transform_2, window_bounds = array<i64: 1, 512>}, {pipeline_mode = #tpu.pipeline_mode<synchronous>, transform_indices = @transform_3, window_bounds = array<i64: 512, 256>}, {pipeline_mode = #tpu.pipeline_mode<synchronous>, transform_indices = @transform_4, window_bounds = array<i64: 1, 256>}, {pipeline_mode = #tpu.pipeline_mode<synchronous>, transform_indices = @transform_5, window_bounds = array<i64: 256, 128>}, {pipeline_mode = #tpu.pipeline_mode<synchronous>, transform_indices = @transform_6, window_bounds = array<i64: 1, 128>}, {transform_indices = @transform_7, window_bounds = array<i64: 8, 128>}]} {
    %c0 = arith.constant 0 : index
    %c0_0 = arith.constant 0 : index
    %0 = vector.load %arg1[%c0, %c0_0] : memref<8x128xbf16, #tpu.memory_space<vmem>>, vector<8x128xbf16>
    %c0_1 = arith.constant 0 : index
    %c0_2 = arith.constant 0 : index
    %1 = vector.load %arg2[%c0_1, %c0_2] : memref<128x512xbf16, #tpu.memory_space<vmem>>, vector<128x512xbf16>
    %cst = arith.constant dense<0.000000e+00> : vector<8x512xf32>
    %2 = tpu.matmul %0, %1, %cst {dimension_numbers = #tpu.dot_dimension_numbers<[1], [0], [0], [1], [0, 0, 1, 1], [], []>} : vector<8x128xbf16>, vector<128x512xbf16>, vector<8x512xf32> -> vector<8x512xf32>
    %c0_3 = arith.constant 0 : index
    %c0_4 = arith.constant 0 : index
    %3 = vector.load %arg3[%c0_3, %c0_4] : memref<1x512xf32, #tpu.memory_space<vmem>>, vector<1x512xf32>
    %4 = vector.broadcast %3 : vector<1x512xf32> to vector<8x512xf32>
    %5 = arith.addf %2, %4 : vector<8x512xf32>
    %cst_5 = arith.constant 0.000000e+00 : f32
    %6 = vector.broadcast %cst_5 : f32 to vector<8x512xf32>
    %7 = arith.maximumf %5, %6 : vector<8x512xf32>
    %8 = arith.truncf %7 : vector<8x512xf32> to vector<8x512xbf16>
    %c0_6 = arith.constant 0 : index
    %c0_7 = arith.constant 0 : index
    %9 = vector.load %arg4[%c0_6, %c0_7] : memref<512x256xbf16, #tpu.memory_space<vmem>>, vector<512x256xbf16>
    %cst_8 = arith.constant dense<0.000000e+00> : vector<8x256xf32>
    %10 = tpu.matmul %8, %9, %cst_8 {dimension_numbers = #tpu.dot_dimension_numbers<[1], [0], [0], [1], [0, 0, 1, 1], [], []>} : vector<8x512xbf16>, vector<512x256xbf16>, vector<8x256xf32> -> vector<8x256xf32>
    %c0_9 = arith.constant 0 : index
    %c0_10 = arith.constant 0 : index
    %11 = vector.load %arg5[%c0_9, %c0_10] : memref<1x256xf32, #tpu.memory_space<vmem>>, vector<1x256xf32>
    %12 = vector.broadcast %11 : vector<1x256xf32> to vector<8x256xf32>
    %13 = arith.addf %10, %12 : vector<8x256xf32>
    %cst_11 = arith.constant 0.000000e+00 : f32
    %14 = vector.broadcast %cst_11 : f32 to vector<8x256xf32>
    %15 = arith.maximumf %13, %14 : vector<8x256xf32>
    %16 = arith.truncf %15 : vector<8x256xf32> to vector<8x256xbf16>
    %c0_12 = arith.constant 0 : index
    %c0_13 = arith.constant 0 : index
    %17 = vector.load %arg6[%c0_12, %c0_13] : memref<256x128xbf16, #tpu.memory_space<vmem>>, vector<256x128xbf16>
    %cst_14 = arith.constant dense<0.000000e+00> : vector<8x128xf32>
    %18 = tpu.matmul %16, %17, %cst_14 {dimension_numbers = #tpu.dot_dimension_numbers<[1], [0], [0], [1], [0, 0, 1, 1], [], []>} : vector<8x256xbf16>, vector<256x128xbf16>, vector<8x128xf32> -> vector<8x128xf32>
    %c0_15 = arith.constant 0 : index
    %c0_16 = arith.constant 0 : index
    %19 = vector.load %arg7[%c0_15, %c0_16] : memref<1x128xf32, #tpu.memory_space<vmem>>, vector<1x128xf32>
    %20 = vector.broadcast %19 : vector<1x128xf32> to vector<8x128xf32>
    %21 = arith.addf %18, %20 : vector<8x128xf32>
    %c0_17 = arith.constant 0 : index
    %c0_18 = arith.constant 0 : index
    %22 = vector.load %arg8[%c0_17, %c0_18] : memref<8x128xf32, #tpu.memory_space<vmem>>, vector<8x128xf32>
    tpu.vector_store %arg8[%c0_17, %c0_18], %21 {strides = array<i32>} : memref<8x128xf32, #tpu.memory_space<vmem>>, vector<8x128xf32>,
    return
  }
  func.func @transform_0(%arg0: i32) -> (i32, i32) {
    %c0_i32 = arith.constant 0 : i32
    %c0_i32_0 = arith.constant 0 : i32
    return %arg0, %c0_i32 : i32, i32
  }
  func.func @transform_1(%arg0: i32) -> (i32, i32) {
    %c0_i32 = arith.constant 0 : i32
    %c0_i32_0 = arith.constant 0 : i32
    %c0_i32_1 = arith.constant 0 : i32
    return %c0_i32, %c0_i32_0 : i32, i32
  }
  func.func @transform_2(%arg0: i32) -> (i32, i32) {
    %c0_i32 = arith.constant 0 : i32
    %c0_i32_0 = arith.constant 0 : i32
    %c0_i32_1 = arith.constant 0 : i32
    return %c0_i32, %c0_i32_0 : i32, i32
  }
  func.func @transform_3(%arg0: i32) -> (i32, i32) {
    %c0_i32 = arith.constant 0 : i32
    %c0_i32_0 = arith.constant 0 : i32
    %c0_i32_1 = arith.constant 0 : i32
    return %c0_i32, %c0_i32_0 : i32, i32
  }
  func.func @transform_4(%arg0: i32) -> (i32, i32) {
    %c0_i32 = arith.constant 0 : i32
    %c0_i32_0 = arith.constant 0 : i32
    %c0_i32_1 = arith.constant 0 : i32
    return %c0_i32, %c0_i32_0 : i32, i32
  }
  func.func @transform_5(%arg0: i32) -> (i32, i32) {
    %c0_i32 = arith.constant 0 : i32
    %c0_i32_0 = arith.constant 0 : i32
    %c0_i32_1 = arith.constant 0 : i32
    return %c0_i32, %c0_i32_0 : i32, i32
  }
  func.func @transform_6(%arg0: i32) -> (i32, i32) {
    %c0_i32 = arith.constant 0 : i32
    %c0_i32_0 = arith.constant 0 : i32
    %c0_i32_1 = arith.constant 0 : i32
    return %c0_i32, %c0_i32_0 : i32, i32
  }
  func.func @transform_7(%arg0: i32) -> (i32, i32) {
    %c0_i32 = arith.constant 0 : i32
    %c0_i32_0 = arith.constant 0 : i32
    return %arg0, %c0_i32 : i32, i32
  }
}

</mosaic_0001>

<bundles_post_ra>
// kernel: dqn_forward.5
= control target key start
LH: loop header
LB: loop body
LE: loop exit
PB: predicated region body
PF: predicated region fallthrough
CT: control target
= control target key end

     0   :  { %v998_v0 = vmov 0   ;;  %s1356_s1 = inlined_call_operand.vmem [shape: bf16[256,128], index: 1, kind: input, shape index: {}]   ;;  %s1357_s0 = inlined_call_operand.vmem [shape: bf16[288,256], index: 0, kind: input, shape index: {}]   ;;  %s1358_s2 = inlined_call_operand.vmem [shape: f32[1,128], index: 2, kind: input, shape index: {}]   ;;  %s1359_s3 = inlined_call_operand.vmem [shape: f32[288,128], index: 3, kind: output, shape index: {}]  }
   0x1   :  { %435 = vmatprep.subr.bf16.mxu0 %v998_v0  ;;  %895 = vmatprep.subr.bf16.mxu1 %v998_v0  ;;  %v928_v1 = vld [vmem:[%s1356_s1] sm:$0xff]   ;;  %v929_v2 = vld [vmem:[%s1356_s1 + $0x8] sm:$0xff]   ;;  %v930_v3 = vld [vmem:[%s1356_s1 + $0x10] sm:$0xff]  }
   0x2   :  { %436 = vmatpush1.bf16.msra.mxu0 %v928_v1  ;;  %911 = vmatpush1.bf16.msra.mxu1 %v928_v1  ;;  %v931_v4 = vld [vmem:[%s1356_s1 + $0x18] sm:$0xff]   ;;  %v932_v5 = vld [vmem:[%s1356_s1 + $0x20] sm:$0xff]   ;;  %v933_v7 = vld [vmem:[%s1356_s1 + $0x28] sm:$0xff]  }
   0x3   :  { %437 = vmatprep.subr.bf16.mxu0 %v998_v0  ;;  %896 = vmatprep.subr.bf16.mxu1 %v998_v0  ;;  %v946_v6 = vld [vmem:[%s1357_s0 + $0x4] ss:$8 sps:$4 sm:$0xff]   ;;  %v949_v8 = vld [vmem:[%s1357_s0 + $0x94] ss:$8 sps:$4 sm:$0xff]   ;;  %v944_v19 = vld [vmem:[%s1357_s0] ss:$8 sps:$4 sm:$0xff]  }
   0x4   :  { %467 = vmatprep.mubr.bf16.mxu0 %v946_v6  ;;  %539 = vmatprep.mubr.bf16.mxu1 %v949_v8  ;;  %v934_v9 = vld [vmem:[%s1356_s1 + $0x30] sm:$0xff]   ;;  %v935_v10 = vld [vmem:[%s1356_s1 + $0x38] sm:$0xff]   ;;  %v936_v11 = vld [vmem:[%s1356_s1 + $0x40] sm:$0xff]  }
   0x5   :  { %v937_v12 = vld [vmem:[%s1356_s1 + $0x48] sm:$0xff]   ;;  %v938_v13 = vld [vmem:[%s1356_s1 + $0x50] sm:$0xff]   ;;  %v939_v14 = vld [vmem:[%s1356_s1 + $0x58] sm:$0xff]  }
   0x6   :  { %438 = vmatpush1.bf16.msra.mxu0 %v929_v2  ;;  %912 = vmatpush1.bf16.msra.mxu1 %v929_v2  ;;  %v940_v15 = vld [vmem:[%s1356_s1 + $0x60] sm:$0xff]   ;;  %v941_v16 = vld [vmem:[%s1356_s1 + $0x68] sm:$0xff]   ;;  %v942_v17 = vld [vmem:[%s1356_s1 + $0x70] sm:$0xff]  }
   0x7   :  { %439 = vmatprep.subr.bf16.mxu0 %v998_v0  ;;  %897 = vmatprep.subr.bf16.mxu1 %v998_v0  ;;  %v943_v18 = vld [vmem:[%s1356_s1 + $0x78] sm:$0xff]   ;;  %v952_v22 = vld [vmem:[%s1357_s0 + $0xa4] ss:$8 sps:$4 sm:$0xff]   ;;  %v955_v24 = vld [vmem:[%s1357_s0 + $0xa0] ss:$8 sps:$4 sm:$0xff]  }
   0x8   :  { %v947_v20 = vld [vmem:[%s1357_s0 + $0x90] ss:$8 sps:$4 sm:$0xff]   ;;  %v950_v21 = vld [vmem:[%s1357_s0 + $0x14] ss:$8 sps:$4 sm:$0xff]   ;;  %v956_v25 = vld [vmem:[%s1357_s0 + $0x24] ss:$8 sps:$4 sm:$0xff]  }
   0x9   :  { %v954_v23 = vld [vmem:[%s1357_s0 + $0x10] ss:$8 sps:$4 sm:$0xff]   ;;  %v958_v26 = vld [vmem:[%s1357_s0 + $0xb4] ss:$8 sps:$4 sm:$0xff]   ;;  %v960_v27 = vld [vmem:[%s1357_s0 + $0x20] ss:$8 sps:$4 sm:$0xff]  }
   0xa   :  { %440 = vmatpush1.bf16.msra.mxu0 %v930_v3  ;;  %913 = vmatpush1.bf16.msra.mxu1 %v930_v3  ;;  %v961_v28 = vld [vmem:[%s1357_s0 + $0xb0] ss:$8 sps:$4 sm:$0xff]   ;;  %v962_v29 = vld [vmem:[%s1357_s0 + $0x34] ss:$8 sps:$4 sm:$0xff]   ;;  %v964_v30 = vld [vmem:[%s1357_s0 + $0xc4] ss:$8 sps:$4 sm:$0xff]  }
   0xb   :  { %441 = vmatprep.subr.bf16.mxu0 %v998_v0  ;;  %898 = vmatprep.subr.bf16.mxu1 %v998_v0  ;;  %v966_v31 = vld [vmem:[%s1357_s0 + $0x30] ss:$8 sps:$4 sm:$0xff]   ;;  %v967_v32 = vld [vmem:[%s1357_s0 + $0xc0] ss:$8 sps:$4 sm:$0xff]   ;;  %v968_v33 = vld [vmem:[%s1357_s0 + $0x44] ss:$8 sps:$4 sm:$0xff]  }
   0xc   :  { %v970_v34 = vld [vmem:[%s1357_s0 + $0xd4] ss:$8 sps:$4 sm:$0xff]   ;;  %v972_v35 = vld [vmem:[%s1357_s0 + $0x40] ss:$8 sps:$4 sm:$0xff]   ;;  %v973_v36 = vld [vmem:[%s1357_s0 + $0xd0] ss:$8 sps:$4 sm:$0xff]  }
   0xd   :  { %v974_v37 = vld [vmem:[%s1357_s0 + $0x54] ss:$8 sps:$4 sm:$0xff]   ;;  %v976_v38 = vld [vmem:[%s1357_s0 + $0xe4] ss:$8 sps:$4 sm:$0xff]   ;;  %v978_v39 = vld [vmem:[%s1357_s0 + $0x50] ss:$8 sps:$4 sm:$0xff]  }
   0xe   :  { %442 = vmatpush1.bf16.msra.mxu0 %v931_v4  ;;  %914 = vmatpush1.bf16.msra.mxu1 %v931_v4  ;;  %v979_v40 = vld [vmem:[%s1357_s0 + $0xe0] ss:$8 sps:$4 sm:$0xff]   ;;  %v980_v41 = vld [vmem:[%s1357_s0 + $0x64] ss:$8 sps:$4 sm:$0xff]   ;;  %v982_v42 = vld [vmem:[%s1357_s0 + $0xf4] ss:$8 sps:$4 sm:$0xff]  }
   0xf   :  { %443 = vmatprep.subr.bf16.mxu0 %v998_v0  ;;  %899 = vmatprep.subr.bf16.mxu1 %v998_v0  ;;  %v984_v43 = vld [vmem:[%s1357_s0 + $0x60] ss:$8 sps:$4 sm:$0xff]   ;;  %v985_v44 = vld [vmem:[%s1357_s0 + $0xf0] ss:$8 sps:$4 sm:$0xff]   ;;  %v986_v45 = vld [vmem:[%s1357_s0 + $0x74] ss:$8 sps:$4 sm:$0xff]  }
  0x10   :  { %v988_v46 = vld [vmem:[%s1357_s0 + $0x104] ss:$8 sps:$4 sm:$0xff]   ;;  %v990_v47 = vld [vmem:[%s1357_s0 + $0x70] ss:$8 sps:$4 sm:$0xff]   ;;  %v991_v48 = vld [vmem:[%s1357_s0 + $0x100] ss:$8 sps:$4 sm:$0xff]  }
  0x11   :  { %v992_v49 = vld [vmem:[%s1357_s0 + $0x84] ss:$8 sps:$4 sm:$0xff]   ;;  %v994_v50 = vld [vmem:[%s1357_s0 + $0x114] ss:$8 sps:$4 sm:$0xff]   ;;  %v996_v51 = vld [vmem:[%s1357_s0 + $0x80] ss:$8 sps:$4 sm:$0xff]  }
  0x12   :  { %444 = vmatpush1.bf16.msra.mxu0 %v932_v5  ;;  %915 = vmatpush1.bf16.msra.mxu1 %v932_v5  ;;  %v997_v52 = vld [vmem:[%s1357_s0 + $0x110] ss:$8 sps:$4 sm:$0xff]   ;;  %v1210_v53 = vld [vmem:[%s1358_s2] ss:$0 sm:$0xff] }
  0x13   :  { %445 = vmatprep.subr.bf16.mxu0 %v998_v0  ;;  %900 = vmatprep.subr.bf16.mxu1 %v998_v0 }
  0x16   :  { %446 = vmatpush1.bf16.msra.mxu0 %v933_v7  ;;  %916 = vmatpush1.bf16.msra.mxu1 %v933_v7 }
  0x17   :  { %447 = vmatprep.subr.bf16.mxu0 %v998_v0  ;;  %901 = vmatprep.subr.bf16.mxu1 %v998_v0 }
  0x1a   :  { %448 = vmatpush1.bf16.msra.mxu0 %v934_v9  ;;  %917 = vmatpush1.bf16.msra.mxu1 %v934_v9 }
  0x1b   :  { %449 = vmatprep.subr.bf16.mxu0 %v998_v0  ;;  %902 = vmatprep.subr.bf16.mxu1 %v998_v0 }
  0x1e   :  { %450 = vmatpush1.bf16.msra.mxu0 %v935_v10  ;;  %918 = vmatpush1.bf16.msra.mxu1 %v935_v10 }
  0x1f   :  { %451 = vmatprep.subr.bf16.mxu0 %v998_v0  ;;  %903 = vmatprep.subr.bf16.mxu1 %v998_v0 }
  0x22   :  { %452 = vmatpush1.bf16.msra.mxu0 %v936_v11  ;;  %919 = vmatpush1.bf16.msra.mxu1 %v936_v11 }
  0x23   :  { %453 = vmatprep.subr.bf16.mxu0 %v998_v0  ;;  %904 = vmatprep.subr.bf16.mxu1 %v998_v0 }
  0x26   :  { %454 = vmatpush1.bf16.msra.mxu0 %v937_v12  ;;  %920 = vmatpush1.bf16.msra.mxu1 %v937_v12 }
  0x27   :  { %455 = vmatprep.subr.bf16.mxu0 %v998_v0  ;;  %905 = vmatprep.subr.bf16.mxu1 %v998_v0 }
  0x2a   :  { %456 = vmatpush1.bf16.msra.mxu0 %v938_v13  ;;  %921 = vmatpush1.bf16.msra.mxu1 %v938_v13 }
  0x2b   :  { %457 = vmatprep.subr.bf16.mxu0 %v998_v0  ;;  %906 = vmatprep.subr.bf16.mxu1 %v998_v0 }
  0x2e   :  { %458 = vmatpush1.bf16.msra.mxu0 %v939_v14  ;;  %922 = vmatpush1.bf16.msra.mxu1 %v939_v14 }
  0x2f   :  { %459 = vmatprep.subr.bf16.mxu0 %v998_v0  ;;  %907 = vmatprep.subr.bf16.mxu1 %v998_v0 }
  0x32   :  { %460 = vmatpush1.bf16.msra.mxu0 %v940_v15  ;;  %923 = vmatpush1.bf16.msra.mxu1 %v940_v15 }
  0x33   :  { %461 = vmatprep.subr.bf16.mxu0 %v998_v0  ;;  %908 = vmatprep.subr.bf16.mxu1 %v998_v0 }
  0x36   :  { %462 = vmatpush1.bf16.msra.mxu0 %v941_v16  ;;  %924 = vmatpush1.bf16.msra.mxu1 %v941_v16 }
  0x37   :  { %463 = vmatprep.subr.bf16.mxu0 %v998_v0  ;;  %909 = vmatprep.subr.bf16.mxu1 %v998_v0 }
  0x3a   :  { %464 = vmatpush1.bf16.msra.mxu0 %v942_v17  ;;  %925 = vmatpush1.bf16.msra.mxu1 %v942_v17 }
  0x3b   :  { %465 = vmatprep.subr.bf16.mxu0 %v998_v0  ;;  %910 = vmatprep.subr.bf16.mxu1 %v998_v0 }
  0x3e   :  { %466 = vmatpush1.bf16.msra.mxu0 %v943_v18  ;;  %926 = vmatpush1.bf16.msra.mxu1 %v943_v18 }
  0x41   :  { %468 = vmatmul.mubr.bf16.vlgmr.msra.gmra.mrb[0].mxu0 %v944_v19  ;;  %540 = vmatmul.mubr.bf16.vlgmr.msra.gmra.mrb[0].mxu1 %v947_v20 }
  0x42   :  { %475 = vmatprep.mubr.bf16.mxu0 %v950_v21  ;;  %547 = vmatprep.mubr.bf16.mxu1 %v952_v22 }
  0x49   :  { %476 = vmatmul.mubr.bf16.gmra.mrb[4].mxu0 %v954_v23  ;;  %548 = vmatmul.mubr.bf16.gmra.mrb[4].mxu1 %v955_v24 }
  0x4a   :  { %483 = vmatprep.mubr.bf16.mxu0 %v956_v25  ;;  %555 = vmatprep.mubr.bf16.mxu1 %v958_v26 }
  0x51   :  { %484 = vmatmul.mubr.bf16.gmra.mrb[8].mxu0 %v960_v27  ;;  %556 = vmatmul.mubr.bf16.gmra.mrb[8].mxu1 %v961_v28 }
  0x52   :  { %491 = vmatprep.mubr.bf16.mxu0 %v962_v29  ;;  %563 = vmatprep.mubr.bf16.mxu1 %v964_v30 }
  0x59   :  { %492 = vmatmul.mubr.bf16.gmra.mrb[12].mxu0 %v966_v31  ;;  %564 = vmatmul.mubr.bf16.gmra.mrb[12].mxu1 %v967_v32 }
  0x5a   :  { %499 = vmatprep.mubr.bf16.mxu0 %v968_v33  ;;  %571 = vmatprep.mubr.bf16.mxu1 %v970_v34 }
  0x61   :  { %500 = vmatmul.mubr.bf16.gmra.mrb[16].mxu0 %v972_v35  ;;  %572 = vmatmul.mubr.bf16.gmra.mrb[16].mxu1 %v973_v36 }
  0x62   :  { %507 = vmatprep.mubr.bf16.mxu0 %v974_v37  ;;  %579 = vmatprep.mubr.bf16.mxu1 %v976_v38 }
  0x69   :  { %508 = vmatmul.mubr.bf16.gmra.mrb[20].mxu0 %v978_v39  ;;  %580 = vmatmul.mubr.bf16.gmra.mrb[20].mxu1 %v979_v40 }
  0x6a   :  { %515 = vmatprep.mubr.bf16.mxu0 %v980_v41  ;;  %587 = vmatprep.mubr.bf16.mxu1 %v982_v42 }
  0x71   :  { %516 = vmatmul.mubr.bf16.gmra.mrb[24].mxu0 %v984_v43  ;;  %588 = vmatmul.mubr.bf16.gmra.mrb[24].mxu1 %v985_v44 }
  0x72   :  { %523 = vmatprep.mubr.bf16.mxu0 %v986_v45  ;;  %595 = vmatprep.mubr.bf16.mxu1 %v988_v46 }
  0x79   :  { %524 = vmatmul.mubr.bf16.gmra.mrb[28].mxu0 %v990_v47  ;;  %596 = vmatmul.mubr.bf16.gmra.mrb[28].mxu1 %v991_v48 }
  0x7a   :  { %531 = vmatprep.mubr.bf16.mxu0 %v992_v49  ;;  %603 = vmatprep.mubr.bf16.mxu1 %v994_v50 }
  0x81   :  { %532 = vmatmul.mubr.bf16.gmra.mrb[32].mxu0 %v996_v51  ;;  %604 = vmatmul.mubr.bf16.gmra.mrb[32].mxu1 %v997_v52 }
 0x114   :  { %v469_v54 = vpop.f32.mrb[0].mxu0  ;;  %v541_v55 = vpop.f32.mrb[0].mxu1 }
 0x115   :  { %v730_v56 = vadd.f32 %v1210_v53, %v469_v54  ;;  %v748_v57 = vadd.f32 %v1210_v53, %v541_v55  ;;  %v471_v58 = vpop.f32.mrb[1].mxu0  ;;  %v543_v59 = vpop.f32.mrb[1].mxu1 }
 0x116   :  { %v472_v60 = vpop.f32.mrb[2].mxu0  ;;  %v544_v61 = vpop.f32.mrb[2].mxu1 }
 0x117   :  { %v766_v62 = vmax.f32 %v730_v56, 0.0  ;;  %v784_v63 = vmax.f32 %v748_v57, 0.0  ;;  %v731_v0 = vadd.f32 %v1210_v53, %v472_v60  ;;  %v749_v1 = vadd.f32 %v1210_v53, %v544_v61  ;;  %v474_v2 = vpop.f32.mrb[3].mxu0  ;;  %v546_v3 = vpop.f32.mrb[3].mxu1 }
 0x119   :  { %802 = vst [vmem:[%s1359_s3] sm:$0xff] %v766_v62  ;;  %820 = vst [vmem:[%s1359_s3 + $0x90] sm:$0xff] %v784_v63  ;;  %v767_v4 = vmax.f32 %v731_v0, 0.0  ;;  %v785_v5 = vmax.f32 %v749_v1, 0.0 }
 0x11b   :  { %803 = vst [vmem:[%s1359_s3 + $0x8] sm:$0xff] %v767_v4  ;;  %821 = vst [vmem:[%s1359_s3 + $0x98] sm:$0xff] %v785_v5 }
 0x11c   :  { %v477_v6 = vpop.f32.mrb[4].mxu0  ;;  %v549_v7 = vpop.f32.mrb[4].mxu1 }
 0x11d   :  { %v732_v8 = vadd.f32 %v1210_v53, %v477_v6  ;;  %v750_v9 = vadd.f32 %v1210_v53, %v549_v7  ;;  %v479_v10 = vpop.f32.mrb[5].mxu0  ;;  %v551_v11 = vpop.f32.mrb[5].mxu1 }
 0x11e   :  { %v480_v12 = vpop.f32.mrb[6].mxu0  ;;  %v552_v13 = vpop.f32.mrb[6].mxu1 }
 0x11f   :  { %v768_v14 = vmax.f32 %v732_v8, 0.0  ;;  %v786_v15 = vmax.f32 %v750_v9, 0.0  ;;  %v733_v16 = vadd.f32 %v1210_v53, %v480_v12  ;;  %v751_v17 = vadd.f32 %v1210_v53, %v552_v13  ;;  %v482_v18 = vpop.f32.mrb[7].mxu0  ;;  %v554_v19 = vpop.f32.mrb[7].mxu1 }
 0x121   :  { %804 = vst [vmem:[%s1359_s3 + $0x10] sm:$0xff] %v768_v14  ;;  %822 = vst [vmem:[%s1359_s3 + $0xa0] sm:$0xff] %v786_v15  ;;  %v769_v20 = vmax.f32 %v733_v16, 0.0  ;;  %v787_v21 = vmax.f32 %v751_v17, 0.0 }
 0x123   :  { %805 = vst [vmem:[%s1359_s3 + $0x18] sm:$0xff] %v769_v20  ;;  %823 = vst [vmem:[%s1359_s3 + $0xa8] sm:$0xff] %v787_v21 }
 0x124   :  { %v485_v22 = vpop.f32.mrb[8].mxu0  ;;  %v557_v23 = vpop.f32.mrb[8].mxu1 }
 0x125   :  { %v734_v24 = vadd.f32 %v1210_v53, %v485_v22  ;;  %v752_v25 = vadd.f32 %v1210_v53, %v557_v23  ;;  %v487_v26 = vpop.f32.mrb[9].mxu0  ;;  %v559_v27 = vpop.f32.mrb[9].mxu1 }
 0x126   :  { %v488_v28 = vpop.f32.mrb[10].mxu0  ;;  %v560_v29 = vpop.f32.mrb[10].mxu1 }
 0x127   :  { %v770_v30 = vmax.f32 %v734_v24, 0.0  ;;  %v788_v31 = vmax.f32 %v752_v25, 0.0  ;;  %v735_v32 = vadd.f32 %v1210_v53, %v488_v28  ;;  %v753_v33 = vadd.f32 %v1210_v53, %v560_v29  ;;  %v490_v34 = vpop.f32.mrb[11].mxu0  ;;  %v562_v35 = vpop.f32.mrb[11].mxu1 }
 0x129   :  { %806 = vst [vmem:[%s1359_s3 + $0x20] sm:$0xff] %v770_v30  ;;  %824 = vst [vmem:[%s1359_s3 + $0xb0] sm:$0xff] %v788_v31  ;;  %v771_v36 = vmax.f32 %v735_v32, 0.0  ;;  %v789_v37 = vmax.f32 %v753_v33, 0.0 }
 0x12b   :  { %807 = vst [vmem:[%s1359_s3 + $0x28] sm:$0xff] %v771_v36  ;;  %825 = vst [vmem:[%s1359_s3 + $0xb8] sm:$0xff] %v789_v37 }
 0x12c   :  { %v493_v38 = vpop.f32.mrb[12].mxu0  ;;  %v565_v39 = vpop.f32.mrb[12].mxu1 }
 0x12d   :  { %v736_v40 = vadd.f32 %v1210_v53, %v493_v38  ;;  %v754_v41 = vadd.f32 %v1210_v53, %v565_v39  ;;  %v495_v42 = vpop.f32.mrb[13].mxu0  ;;  %v567_v43 = vpop.f32.mrb[13].mxu1 }
 0x12e   :  { %v496_v44 = vpop.f32.mrb[14].mxu0  ;;  %v568_v45 = vpop.f32.mrb[14].mxu1 }
 0x12f   :  { %v772_v46 = vmax.f32 %v736_v40, 0.0  ;;  %v790_v47 = vmax.f32 %v754_v41, 0.0  ;;  %v737_v48 = vadd.f32 %v1210_v53, %v496_v44  ;;  %v755_v49 = vadd.f32 %v1210_v53, %v568_v45  ;;  %v498_v50 = vpop.f32.mrb[15].mxu0  ;;  %v570_v51 = vpop.f32.mrb[15].mxu1 }
 0x131   :  { %808 = vst [vmem:[%s1359_s3 + $0x30] sm:$0xff] %v772_v46  ;;  %826 = vst [vmem:[%s1359_s3 + $0xc0] sm:$0xff] %v790_v47  ;;  %v773_v52 = vmax.f32 %v737_v48, 0.0  ;;  %v791_v54 = vmax.f32 %v755_v49, 0.0 }
 0x133   :  { %809 = vst [vmem:[%s1359_s3 + $0x38] sm:$0xff] %v773_v52  ;;  %827 = vst [vmem:[%s1359_s3 + $0xc8] sm:$0xff] %v791_v54 }
 0x134   :  { %v501_v55 = vpop.f32.mrb[16].mxu0  ;;  %v573_v56 = vpop.f32.mrb[16].mxu1 }
 0x135   :  { %v738_v57 = vadd.f32 %v1210_v53, %v501_v55  ;;  %v756_v58 = vadd.f32 %v1210_v53, %v573_v56  ;;  %v503_v59 = vpop.f32.mrb[17].mxu0  ;;  %v575_v60 = vpop.f32.mrb[17].mxu1 }
 0x136   :  { %v504_v61 = vpop.f32.mrb[18].mxu0  ;;  %v576_v62 = vpop.f32.mrb[18].mxu1 }
 0x137   :  { %v774_v63 = vmax.f32 %v738_v57, 0.0  ;;  %v792_v0 = vmax.f32 %v756_v58, 0.0  ;;  %v739_v1 = vadd.f32 %v1210_v53, %v504_v61  ;;  %v757_v2 = vadd.f32 %v1210_v53, %v576_v62  ;;  %v506_v3 = vpop.f32.mrb[19].mxu0  ;;  %v578_v4 = vpop.f32.mrb[19].mxu1 }
 0x139   :  { %810 = vst [vmem:[%s1359_s3 + $0x40] sm:$0xff] %v774_v63  ;;  %828 = vst [vmem:[%s1359_s3 + $0xd0] sm:$0xff] %v792_v0  ;;  %v775_v5 = vmax.f32 %v739_v1, 0.0  ;;  %v793_v6 = vmax.f32 %v757_v2, 0.0 }
 0x13b   :  { %811 = vst [vmem:[%s1359_s3 + $0x48] sm:$0xff] %v775_v5  ;;  %829 = vst [vmem:[%s1359_s3 + $0xd8] sm:$0xff] %v793_v6 }
 0x13c   :  { %v509_v7 = vpop.f32.mrb[20].mxu0  ;;  %v581_v8 = vpop.f32.mrb[20].mxu1 }
 0x13d   :  { %v740_v9 = vadd.f32 %v1210_v53, %v509_v7  ;;  %v758_v10 = vadd.f32 %v1210_v53, %v581_v8  ;;  %v511_v11 = vpop.f32.mrb[21].mxu0  ;;  %v583_v12 = vpop.f32.mrb[21].mxu1 }
 0x13e   :  { %v512_v13 = vpop.f32.mrb[22].mxu0  ;;  %v584_v14 = vpop.f32.mrb[22].mxu1 }
 0x13f   :  { %v776_v15 = vmax.f32 %v740_v9, 0.0  ;;  %v794_v16 = vmax.f32 %v758_v10, 0.0  ;;  %v741_v17 = vadd.f32 %v1210_v53, %v512_v13  ;;  %v759_v18 = vadd.f32 %v1210_v53, %v584_v14  ;;  %v514_v19 = vpop.f32.mrb[23].mxu0  ;;  %v586_v20 = vpop.f32.mrb[23].mxu1 }
 0x141   :  { %812 = vst [vmem:[%s1359_s3 + $0x50] sm:$0xff] %v776_v15  ;;  %830 = vst [vmem:[%s1359_s3 + $0xe0] sm:$0xff] %v794_v16  ;;  %v777_v21 = vmax.f32 %v741_v17, 0.0  ;;  %v795_v22 = vmax.f32 %v759_v18, 0.0 }
 0x143   :  { %813 = vst [vmem:[%s1359_s3 + $0x58] sm:$0xff] %v777_v21  ;;  %831 = vst [vmem:[%s1359_s3 + $0xe8] sm:$0xff] %v795_v22 }
 0x144   :  { %v517_v23 = vpop.f32.mrb[24].mxu0  ;;  %v589_v24 = vpop.f32.mrb[24].mxu1 }
 0x145   :  { %v742_v25 = vadd.f32 %v1210_v53, %v517_v23  ;;  %v760_v26 = vadd.f32 %v1210_v53, %v589_v24  ;;  %v519_v27 = vpop.f32.mrb[25].mxu0  ;;  %v591_v28 = vpop.f32.mrb[25].mxu1 }
 0x146   :  { %v520_v29 = vpop.f32.mrb[26].mxu0  ;;  %v592_v30 = vpop.f32.mrb[26].mxu1 }
 0x147   :  { %v778_v31 = vmax.f32 %v742_v25, 0.0  ;;  %v796_v32 = vmax.f32 %v760_v26, 0.0  ;;  %v743_v33 = vadd.f32 %v1210_v53, %v520_v29  ;;  %v761_v34 = vadd.f32 %v1210_v53, %v592_v30  ;;  %v522_v35 = vpop.f32.mrb[27].mxu0  ;;  %v594_v36 = vpop.f32.mrb[27].mxu1 }
 0x149   :  { %814 = vst [vmem:[%s1359_s3 + $0x60] sm:$0xff] %v778_v31  ;;  %832 = vst [vmem:[%s1359_s3 + $0xf0] sm:$0xff] %v796_v32  ;;  %v779_v37 = vmax.f32 %v743_v33, 0.0  ;;  %v797_v38 = vmax.f32 %v761_v34, 0.0 }
 0x14b   :  { %815 = vst [vmem:[%s1359_s3 + $0x68] sm:$0xff] %v779_v37  ;;  %833 = vst [vmem:[%s1359_s3 + $0xf8] sm:$0xff] %v797_v38 }
 0x14c   :  { %v525_v39 = vpop.f32.mrb[28].mxu0  ;;  %v597_v40 = vpop.f32.mrb[28].mxu1 }
 0x14d   :  { %v744_v41 = vadd.f32 %v1210_v53, %v525_v39  ;;  %v762_v42 = vadd.f32 %v1210_v53, %v597_v40  ;;  %v527_v43 = vpop.f32.mrb[29].mxu0  ;;  %v599_v44 = vpop.f32.mrb[29].mxu1 }
 0x14e   :  { %v528_v45 = vpop.f32.mrb[30].mxu0  ;;  %v600_v46 = vpop.f32.mrb[30].mxu1 }
 0x14f   :  { %v780_v47 = vmax.f32 %v744_v41, 0.0  ;;  %v798_v48 = vmax.f32 %v762_v42, 0.0  ;;  %v745_v49 = vadd.f32 %v1210_v53, %v528_v45  ;;  %v763_v50 = vadd.f32 %v1210_v53, %v600_v46  ;;  %v530_v51 = vpop.f32.mrb[31].mxu0  ;;  %v602_v52 = vpop.f32.mrb[31].mxu1 }
 0x151   :  { %816 = vst [vmem:[%s1359_s3 + $0x70] sm:$0xff] %v780_v47  ;;  %834 = vst [vmem:[%s1359_s3 + $0x100] sm:$0xff] %v798_v48  ;;  %v781_v54 = vmax.f32 %v745_v49, 0.0  ;;  %v799_v55 = vmax.f32 %v763_v50, 0.0 }
 0x153   :  { %817 = vst [vmem:[%s1359_s3 + $0x78] sm:$0xff] %v781_v54  ;;  %835 = vst [vmem:[%s1359_s3 + $0x108] sm:$0xff] %v799_v55 }
 0x154   :  { %v533_v56 = vpop.f32.mrb[32].mxu0  ;;  %v605_v57 = vpop.f32.mrb[32].mxu1 }
 0x155   :  { %v746_v58 = vadd.f32 %v1210_v53, %v533_v56  ;;  %v764_v59 = vadd.f32 %v1210_v53, %v605_v57  ;;  %v535_v60 = vpop.f32.mrb[33].mxu0  ;;  %v607_v61 = vpop.f32.mrb[33].mxu1 }
 0x156   :  { %v536_v62 = vpop.f32.mrb[34].mxu0  ;;  %v608_v63 = vpop.f32.mrb[34].mxu1 }
 0x157   :  { %v782_v0 = vmax.f32 %v746_v58, 0.0  ;;  %v800_v1 = vmax.f32 %v764_v59, 0.0  ;;  %v747_v2 = vadd.f32 %v1210_v53, %v536_v62  ;;  %v765_v3 = vadd.f32 %v1210_v53, %v608_v63  ;;  %v538_v4 = vpop.f32.mrb[35].mxu0  ;;  %v610_v5 = vpop.f32.mrb[35].mxu1 }
 0x159   :  { %818 = vst [vmem:[%s1359_s3 + $0x80] sm:$0xff] %v782_v0  ;;  %836 = vst [vmem:[%s1359_s3 + $0x110] sm:$0xff] %v800_v1  ;;  %v783_v6 = vmax.f32 %v747_v2, 0.0  ;;  %v801_v7 = vmax.f32 %v765_v3, 0.0 }
 0x15b   :  { %819 = vst [vmem:[%s1359_s3 + $0x88] sm:$0xff] %v783_v6  ;;  %837 = vst [vmem:[%s1359_s3 + $0x118] sm:$0xff] %v801_v7 }

// kernel: dqn_forward.6
= control target key start
LH: loop header
LB: loop body
LE: loop exit
PB: predicated region body
PF: predicated region fallthrough
CT: control target
= control target key end

     0   :  { %s935_s1 = inlined_call_operand.vmem [shape: bf16[512,128], index: 1, kind: input, shape index: {}]   ;;  %s936_s0 = inlined_call_operand.vmem [shape: bf16[56,512], index: 0, kind: input, shape index: {}]   ;;  %s937_s2 = inlined_call_operand.vmem [shape: f32[1,128], index: 2, kind: input, shape index: {}]   ;;  %s938_s3 = inlined_call_operand.vmem [shape: f32[56,128], index: 3, kind: output, shape index: {}]  }
   0x1   :  { %v690_v0 = vld [vmem:[%s935_s1 + $0x40] sm:$0xff]   ;;  %v694_v4 = vld [vmem:[%s935_s1 + $0x48] sm:$0xff]   ;;  %v698_v8 = vld [vmem:[%s935_s1 + $0x50] sm:$0xff]  }
   0x2   :  { %v691_v1 = vld [vmem:[%s935_s1 + $0xc0] sm:$0xff]   ;;  %610 = vmatprep.subr.bf16.mxu0 %v690_v0  ;;  %v695_v5 = vld [vmem:[%s935_s1 + $0xc8] sm:$0xff]   ;;  %v699_v9 = vld [vmem:[%s935_s1 + $0xd0] sm:$0xff]  }
   0x3   :  { %v692_v2 = vld [vmem:[%s935_s1] sm:$0xff]   ;;  %650 = vmatprep.subr.bf16.mxu1 %v691_v1  ;;  %v696_v6 = vld [vmem:[%s935_s1 + $0x8] sm:$0xff]   ;;  %v700_v10 = vld [vmem:[%s935_s1 + $0x10] sm:$0xff]  }
   0x4   :  { %v693_v3 = vld [vmem:[%s935_s1 + $0x80] sm:$0xff]   ;;  %611 = vmatpush3.bf16.msra.mxu0 %v692_v2  ;;  %v697_v7 = vld [vmem:[%s935_s1 + $0x88] sm:$0xff]   ;;  %v701_v11 = vld [vmem:[%s935_s1 + $0x90] sm:$0xff]  }
   0x5   :  { %651 = vmatpush3.bf16.msra.mxu1 %v693_v3  ;;  %612 = vmatprep.subr.bf16.mxu0 %v694_v4  ;;  %v702_v12 = vld [vmem:[%s935_s1 + $0x58] sm:$0xff]   ;;  %v706_v16 = vld [vmem:[%s935_s1 + $0x60] sm:$0xff]   ;;  %v710_v20 = vld [vmem:[%s935_s1 + $0x68] sm:$0xff]  }
   0x6   :  { %652 = vmatprep.subr.bf16.mxu1 %v695_v5  ;;  %v703_v13 = vld [vmem:[%s935_s1 + $0xd8] sm:$0xff]   ;;  %v707_v17 = vld [vmem:[%s935_s1 + $0xe0] sm:$0xff]   ;;  %v711_v21 = vld [vmem:[%s935_s1 + $0xe8] sm:$0xff]  }
   0x7   :  { %v704_v14 = vld [vmem:[%s935_s1 + $0x18] sm:$0xff]   ;;  %v708_v18 = vld [vmem:[%s935_s1 + $0x20] sm:$0xff]   ;;  %v712_v22 = vld [vmem:[%s935_s1 + $0x28] sm:$0xff]  }
   0x8   :  { %613 = vmatpush3.bf16.msra.mxu0 %v696_v6  ;;  %v705_v15 = vld [vmem:[%s935_s1 + $0x98] sm:$0xff]   ;;  %v709_v19 = vld [vmem:[%s935_s1 + $0xa0] sm:$0xff]   ;;  %v713_v23 = vld [vmem:[%s935_s1 + $0xa8] sm:$0xff]  }
   0x9   :  { %653 = vmatpush3.bf16.msra.mxu1 %v697_v7  ;;  %614 = vmatprep.subr.bf16.mxu0 %v698_v8  ;;  %v714_v24 = vld [vmem:[%s935_s1 + $0x70] sm:$0xff]   ;;  %v718_v28 = vld [vmem:[%s935_s1 + $0x78] sm:$0xff]   ;;  %v45_v42 = vld [vmem:[%s936_s0 + $0x60] sm:$0xff] }
   0xa   :  { %654 = vmatprep.subr.bf16.mxu1 %v699_v9  ;;  %v715_v25 = vld [vmem:[%s935_s1 + $0xf0] sm:$0xff]   ;;  %v719_v29 = vld [vmem:[%s935_s1 + $0xf8] sm:$0xff]   ;;  %v46_v43 = vld [vmem:[%s936_s0 + $0x68] sm:$0xff]  ;;  %v574_v46 = vcombine.high %v45_v42, %v45_v42  ;;  %v573_v48 = vcombine.low %v45_v42, %v45_v42 }
   0xb   :  { %v716_v26 = vld [vmem:[%s935_s1 + $0x30] sm:$0xff]   ;;  %v720_v30 = vld [vmem:[%s935_s1 + $0x38] sm:$0xff]   ;;  %v576_v47 = vcombine.high %v46_v43, %v46_v43  ;;  %v575_v49 = vcombine.low %v46_v43, %v46_v43  ;;  %v905_v59 = vld [vmem:[%s937_s2] ss:$0 sm:$0xff] }
   0xc   :  { %615 = vmatpush3.bf16.msra.mxu0 %v700_v10  ;;  %v717_v27 = vld [vmem:[%s935_s1 + $0xb0] sm:$0xff]   ;;  %v721_v31 = vld [vmem:[%s935_s1 + $0xb8] sm:$0xff]  }
   0xd   :  { %655 = vmatpush3.bf16.msra.mxu1 %v701_v11  ;;  %616 = vmatprep.subr.bf16.mxu0 %v702_v12  ;;  %v722_v32 = vld [vmem:[%s936_s0] ss:$16 sps:$4 sm:$0xff]   ;;  %v724_v33 = vld [vmem:[%s936_s0 + $0x4] ss:$16 sps:$4 sm:$0xff]   ;;  %v725_v34 = vld [vmem:[%s936_s0 + $0x8] ss:$16 sps:$4 sm:$0xff]  }
   0xe   :  { %656 = vmatprep.subr.bf16.mxu1 %v703_v13  ;;  %v727_v35 = vld [vmem:[%s936_s0 + $0xc] ss:$16 sps:$4 sm:$0xff]   ;;  %409 = vmatprep.mubr.bf16.mxu0 %v724_v33  ;;  %v728_v36 = vld [vmem:[%s936_s0 + $0x24] ss:$16 sps:$4 sm:$0xff]   ;;  %v732_v38 = vld [vmem:[%s936_s0 + $0x20] ss:$16 sps:$4 sm:$0xff]  }
   0xf   :  { %473 = vmatprep.mubr.bf16.mxu1 %v727_v35  ;;  %v730_v37 = vld [vmem:[%s936_s0 + $0x2c] ss:$16 sps:$4 sm:$0xff]   ;;  %v733_v39 = vld [vmem:[%s936_s0 + $0x28] ss:$16 sps:$4 sm:$0xff]   ;;  %v734_v40 = vld [vmem:[%s936_s0 + $0x44] ss:$16 sps:$4 sm:$0xff]  }
  0x10   :  { %617 = vmatpush3.bf16.msra.mxu0 %v704_v14  ;;  %v736_v41 = vld [vmem:[%s936_s0 + $0x4c] ss:$16 sps:$4 sm:$0xff]   ;;  %v738_v44 = vld [vmem:[%s936_s0 + $0x40] ss:$16 sps:$4 sm:$0xff]   ;;  %v739_v45 = vld [vmem:[%s936_s0 + $0x48] ss:$16 sps:$4 sm:$0xff]  }
  0x11   :  { %657 = vmatpush3.bf16.msra.mxu1 %v705_v15  ;;  %618 = vmatprep.subr.bf16.mxu0 %v706_v16 }
  0x12   :  { %658 = vmatprep.subr.bf16.mxu1 %v707_v17 }
  0x14   :  { %619 = vmatpush3.bf16.msra.mxu0 %v708_v18 }
  0x15   :  { %659 = vmatpush3.bf16.msra.mxu1 %v709_v19  ;;  %620 = vmatprep.subr.bf16.mxu0 %v710_v20 }
  0x16   :  { %660 = vmatprep.subr.bf16.mxu1 %v711_v21 }
  0x18   :  { %621 = vmatpush3.bf16.msra.mxu0 %v712_v22 }
  0x19   :  { %661 = vmatpush3.bf16.msra.mxu1 %v713_v23  ;;  %622 = vmatprep.subr.bf16.mxu0 %v714_v24 }
  0x1a   :  { %662 = vmatprep.subr.bf16.mxu1 %v715_v25 }
  0x1c   :  { %623 = vmatpush3.bf16.msra.mxu0 %v716_v26 }
  0x1d   :  { %663 = vmatpush3.bf16.msra.mxu1 %v717_v27  ;;  %624 = vmatprep.subr.bf16.mxu0 %v718_v28 }
  0x1e   :  { %664 = vmatprep.subr.bf16.mxu1 %v719_v29 }
  0x20   :  { %625 = vmatpush3.bf16.msra.mxu0 %v720_v30 }
  0x21   :  { %665 = vmatpush3.bf16.msra.mxu1 %v721_v31 }
  0x23   :  { %410 = vmatmul.mubr.bf16.vlgmr.msra.gmra.mrb[0].mxu0 %v722_v32 }
  0x24   :  { %474 = vmatmul.mubr.bf16.vlgmr.msra.gmra.mrb[0].mxu1 %v725_v34  ;;  %417 = vmatprep.mubr.bf16.mxu0 %v728_v36 }
  0x25   :  { %481 = vmatprep.mubr.bf16.mxu1 %v730_v37 }
  0x2b   :  { %418 = vmatmul.mubr.bf16.gmra.mrb[4].mxu0 %v732_v38 }
  0x2c   :  { %482 = vmatmul.mubr.bf16.gmra.mrb[4].mxu1 %v733_v39  ;;  %425 = vmatprep.mubr.bf16.mxu0 %v734_v40 }
  0x2d   :  { %489 = vmatprep.mubr.bf16.mxu1 %v736_v41 }
  0x33   :  { %426 = vmatmul.mubr.bf16.gmra.mrb[8].mxu0 %v738_v44 }
  0x34   :  { %490 = vmatmul.mubr.bf16.gmra.mrb[8].mxu1 %v739_v45  ;;  %433 = vmatprep.mubr.bf16.mxu0 %v574_v46 }
  0x35   :  { %497 = vmatprep.mubr.bf16.mxu1 %v576_v47 }
  0x3b   :  { %434 = vmatmul.mubr.bf16.gmra.mrb[12].mxu0 %v573_v48 }
  0x3c   :  { %498 = vmatmul.mubr.bf16.gmra.mrb[12].mxu1 %v575_v49 }
  0xf6   :  { %v626_v50 = vpop.f32.mrb[0].mxu0 }
  0xf7   :  { %v666_v51 = vpop.f32.mrb[0].mxu1  ;;  %v627_v52 = vpop.f32.mrb[1].mxu0 }
  0xf8   :  { %v628_v53 = vadd.f32 %v627_v52, %v626_v50  ;;  %v667_v54 = vpop.f32.mrb[1].mxu1  ;;  %v629_v55 = vpop.f32.mrb[2].mxu0 }
  0xf9   :  { %v668_v56 = vadd.f32 %v667_v54, %v666_v51  ;;  %v669_v57 = vpop.f32.mrb[2].mxu1  ;;  %v630_v58 = vpop.f32.mrb[3].mxu0 }
  0xfa   :  { %v631_v60 = vadd.f32 %v630_v58, %v629_v55  ;;  %v670_v61 = vpop.f32.mrb[3].mxu1 }
  0xfb   :  { %v476_v62 = vadd.f32 %v668_v56, %v628_v53  ;;  %v671_v63 = vadd.f32 %v670_v61, %v669_v57 }
  0xfd   :  { %v536_v0 = vadd.f32 %v905_v59, %v476_v62  ;;  %v479_v1 = vadd.f32 %v671_v63, %v631_v60 }
  0xfe   :  { %v632_v2 = vpop.f32.mrb[4].mxu0 }
  0xff   :  { %v543_v3 = vmax.f32 %v536_v0, 0.0  ;;  %v537_v4 = vadd.f32 %v905_v59, %v479_v1  ;;  %v672_v5 = vpop.f32.mrb[4].mxu1  ;;  %v633_v6 = vpop.f32.mrb[5].mxu0 }
 0x100   :  { %v634_v7 = vadd.f32 %v633_v6, %v632_v2  ;;  %v673_v8 = vpop.f32.mrb[5].mxu1  ;;  %v635_v9 = vpop.f32.mrb[6].mxu0 }
 0x101   :  { %550 = vst [vmem:[%s938_s3] sm:$0xff] %v543_v3  ;;  %v544_v10 = vmax.f32 %v537_v4, 0.0  ;;  %v674_v11 = vadd.f32 %v673_v8, %v672_v5  ;;  %v675_v12 = vpop.f32.mrb[6].mxu1  ;;  %v636_v13 = vpop.f32.mrb[7].mxu0 }
 0x102   :  { %v637_v14 = vadd.f32 %v636_v13, %v635_v9  ;;  %v676_v15 = vpop.f32.mrb[7].mxu1 }
 0x103   :  { %551 = vst [vmem:[%s938_s3 + $0x8] sm:$0xff] %v544_v10  ;;  %v484_v16 = vadd.f32 %v674_v11, %v634_v7  ;;  %v677_v17 = vadd.f32 %v676_v15, %v675_v12 }
 0x105   :  { %v538_v18 = vadd.f32 %v905_v59, %v484_v16  ;;  %v487_v19 = vadd.f32 %v677_v17, %v637_v14 }
 0x106   :  { %v638_v20 = vpop.f32.mrb[8].mxu0 }
 0x107   :  { %v545_v21 = vmax.f32 %v538_v18, 0.0  ;;  %v539_v22 = vadd.f32 %v905_v59, %v487_v19  ;;  %v678_v23 = vpop.f32.mrb[8].mxu1  ;;  %v639_v24 = vpop.f32.mrb[9].mxu0 }
 0x108   :  { %v640_v25 = vadd.f32 %v639_v24, %v638_v20  ;;  %v679_v26 = vpop.f32.mrb[9].mxu1  ;;  %v641_v27 = vpop.f32.mrb[10].mxu0 }
 0x109   :  { %552 = vst [vmem:[%s938_s3 + $0x10] sm:$0xff] %v545_v21  ;;  %v546_v28 = vmax.f32 %v539_v22, 0.0  ;;  %v680_v29 = vadd.f32 %v679_v26, %v678_v23  ;;  %v681_v30 = vpop.f32.mrb[10].mxu1  ;;  %v642_v31 = vpop.f32.mrb[11].mxu0 }
 0x10a   :  { %v643_v32 = vadd.f32 %v642_v31, %v641_v27  ;;  %v682_v33 = vpop.f32.mrb[11].mxu1 }
 0x10b   :  { %553 = vst [vmem:[%s938_s3 + $0x18] sm:$0xff] %v546_v28  ;;  %v492_v34 = vadd.f32 %v680_v29, %v640_v25  ;;  %v683_v35 = vadd.f32 %v682_v33, %v681_v30 }
 0x10d   :  { %v540_v36 = vadd.f32 %v905_v59, %v492_v34  ;;  %v495_v37 = vadd.f32 %v683_v35, %v643_v32 }
 0x10e   :  { %v644_v38 = vpop.f32.mrb[12].mxu0 }
 0x10f   :  { %v547_v39 = vmax.f32 %v540_v36, 0.0  ;;  %v541_v40 = vadd.f32 %v905_v59, %v495_v37  ;;  %v684_v41 = vpop.f32.mrb[12].mxu1  ;;  %v645_v42 = vpop.f32.mrb[13].mxu0 }
 0x110   :  { %v646_v43 = vadd.f32 %v645_v42, %v644_v38  ;;  %v685_v44 = vpop.f32.mrb[13].mxu1  ;;  %v647_v45 = vpop.f32.mrb[14].mxu0 }
 0x111   :  { %554 = vst [vmem:[%s938_s3 + $0x20] sm:$0xff] %v547_v39  ;;  %v548_v46 = vmax.f32 %v541_v40, 0.0  ;;  %v686_v47 = vadd.f32 %v685_v44, %v684_v41  ;;  %v687_v48 = vpop.f32.mrb[14].mxu1  ;;  %v648_v49 = vpop.f32.mrb[15].mxu0 }
 0x112   :  { %v688_v50 = vpop.f32.mrb[15].mxu1 }
 0x113   :  { %555 = vst [vmem:[%s938_s3 + $0x28] sm:$0xff] %v548_v46  ;;  %v500_v51 = vadd.f32 %v686_v47, %v646_v43 }
 0x115   :  { %v542_v52 = vadd.f32 %v905_v59, %v500_v51 }
 0x117   :  { %v549_v53 = vmax.f32 %v542_v52, 0.0 }
 0x119   :  { %556 = vst [vmem:[%s938_s3 + $0x30] sm:$0xff] %v549_v53 }

// kernel: dqn_forward.7
= control target key start
LH: loop header
LB: loop body
LE: loop exit
PB: predicated region body
PF: predicated region fallthrough
CT: control target
= control target key end

     0   :  { %s1085_s12 = smov 0   ;;  %s1087_s13 = smov 0   ;;  %s1206_s0 = inlined_call_operand.vmem [shape: bf16[24,1024], index: 0, kind: input, shape index: {}]   ;;  %s1207_s1 = inlined_call_operand.vmem [shape: bf16[1024,128], index: 1, kind: input, shape index: {}]   ;;  %s1208_s2 = inlined_call_operand.vmem [shape: f32[1,128], index: 2, kind: input, shape index: {}]   ;;  %s1209_s3 = inlined_call_operand.vmem [shape: f32[24,128], index: 3, kind: output, shape index: {}]  }
   0x1   :  { %s1089_s14 = smov 0   ;;  %s1091_s15 = smov 0  }
   0x2   :  { %s1093_s16 = smov 0  }
   0x3 LB: > { %s25_s17 = sadd.s32 1, %s1058_s15  ;;  %p48_p1 = scmp.ne.s32.totalorder %s1050_s13, %s1046_s12  ;;  %s1062_s16 = sphi %s1093_s16, %s13_s16   ;;  %s1058_s15 = sphi %s1091_s15, %s1213_s15   ;;  %s1054_s14 = sphi %s1089_s14, %s1212_s14   ;;  %s1050_s13 = sphi %s1087_s13, %s1211_s13   ;;  %s1046_s12 = sphi %s1085_s12, %s1210_s12  }
   0x4   : > { %p26_p0 = scmp.ge.s32.totalorder %s25_s17, 2  ;;  %p49_p2 = scmp.eq.s32.totalorder %s1062_s16, 0 }
   0x5   : > { %s41_s19 = sadd.s32 1, %s1050_s13  ;;  %p829_p5 = scmp.ge.s32.totalorder %s1062_s16, 2 }
   0x6   : > { %s1215_s17 = smov (%p26_p0, %s25_s17), 0  ;;  %p50_p3 = por %p49_p2, %p48_p1 }
   0x7   : > { %s37_s18 = ssub.s32 %s1058_s15, %s1215_s17  ;;  %162 = sbr.rel (%p829_p5) target bundleno = 21 (0x15), region = 20 }
   0x8   : > { %p39_p4 = scmp.eq.s32.totalorder %s37_s18, 0 }
   0xa   : > { %s1120_s20 = scalar_select %p39_p4, %s1050_s13, %s41_s19  }
   0xe   : > { %165 = sbr.rel (!%p50_p3) target bundleno = 21 (0x15), region = 24  ;;  %s167_s21 = sand.u32 (%p50_p3), 1, %s1050_s13  }
   0xf   : > { %s882_s22 = sshll.u32 (%p50_p3), %s1058_s15, 4  ;;  %s939_s23 = smul.u32 (%p50_p3), 48, %s167_s21 }
  0x10   : > { %s175_s26 = scalar_lea.vmem (%p50_p3), %s1206_s0, %s882_s22 }
  0x11   : > { %v188_v0 = vld [vmem:[%s175_s26] sm:$0xff] (%p50_p3)  ;;  %v190_v1 = vld [vmem:[%s175_s26 + $0x8] sm:$0xff] (%p50_p3)  ;;  %s169_s27 = scalar_lea.vmem (%p50_p3), [#allocation3], %s939_s23 }
  0x12   : > { %v192_v2 = vld [vmem:[%s175_s26 + $0x20] sm:$0xff] (%p50_p3)  ;;  %v194_v3 = vld [vmem:[%s175_s26 + $0x28] sm:$0xff] (%p50_p3)  ;;  %189 = vst [vmem:[%s169_s27] sm:$0xff] (%p50_p3), %v188_v0  ;;  %191 = vst [vmem:[%s169_s27 + $0x8] sm:$0xff] (%p50_p3), %v190_v1 }
  0x13   : > { %v196_v4 = vld [vmem:[%s175_s26 + $0x40] sm:$0xff] (%p50_p3)  ;;  %v198_v5 = vld [vmem:[%s175_s26 + $0x48] sm:$0xff] (%p50_p3)  ;;  %193 = vst [vmem:[%s169_s27 + $0x10] sm:$0xff] (%p50_p3), %v192_v2  ;;  %195 = vst [vmem:[%s169_s27 + $0x18] sm:$0xff] (%p50_p3), %v194_v3 }
  0x14   : > { %197 = vst [vmem:[%s169_s27 + $0x20] sm:$0xff] (%p50_p3), %v196_v4  ;;  %199 = vst [vmem:[%s169_s27 + $0x28] sm:$0xff] (%p50_p3), %v198_v5 }
  0x15 PF: > { %p832_p6 = scmp.ge.s32.totalorder %s1062_s16, 1  ;;  %p216_p7 = scmp.lt.s32.totalorder %s1062_s16, 3 }
  0x17   : > { %p217_p8 = pnand %p832_p6, %p216_p7 }
  0x18   : > { %s223_s28 = sand.u32 (!%p217_p8), 1, %s1046_s12   ;;  %s833_s29 = sshll.u32 (!%p217_p8), %s1054_s14, 6 }
  0x19   : > { %220 = sbr.rel (%p217_p8) target bundleno = 314 (0x13a), region = 51  ;;  %p263_p9 = scmp.lt.s32.totalorder (!%p217_p8), %s833_s29, 127 }
  0x1a   : > { %s940_s30 = smul.u32 (!%p217_p8), 48, %s223_s28  ;;  %p835_p10 = scmp.ne.s32.totalorder (!%p217_p8), %s1054_s14, 0 }
  0x1c   : > { %s1137_s8 = scalar_lea.vmem (!%p217_p8), [#allocation3], %s940_s30 }
  0x20   : > { %s1217_s29 = smov (!%p263_p9, %s833_s29), 127  ;;  %287 = sbr.rel (%p835_p10) target bundleno = 39 (0x27), region = 59 }
  0x21   : > { %s834_s4 = sshll.u32 %s1217_s29, 2  ;;  %v1064_v6 = vmov (!%p835_p10), 0.0  }
  0x22   : > { %s1135_s7 = scalar_lea.vmem %s1207_s1, %s834_s4  ;;  %288 = vst [vmem:[#allocation2] sm:$0xff] (!%p835_p10), %v1064_v6  ;;  %289 = vst [vmem:[#allocation2 + $0x8] sm:$0xff] (!%p835_p10), %v1064_v6 }
  0x23   : > { %290 = vst [vmem:[#allocation2 + $0x10] sm:$0xff] (!%p835_p10), %v1064_v6 }
  0x27 PF: > { %v982_v7 = vld [vmem:[%s1135_s7 + $0x40] sm:$0xff]   ;;  %v986_v11 = vld [vmem:[%s1135_s7 + $0x48] sm:$0xff]   ;;  %v990_v15 = vld [vmem:[%s1135_s7 + $0x50] sm:$0xff]   ;;  %p876_p11 = scmp.ne.s32.totalorder %s1054_s14, 1 }
  0x28   : > { %v983_v8 = vld [vmem:[%s1135_s7 + $0xc0] sm:$0xff]   ;;  %883 = vmatprep.subr.bf16.mxu0 %v982_v7  ;;  %v987_v12 = vld [vmem:[%s1135_s7 + $0xc8] sm:$0xff]   ;;  %v991_v16 = vld [vmem:[%s1135_s7 + $0xd0] sm:$0xff]  }
  0x29   : > { %v984_v9 = vld [vmem:[%s1135_s7] sm:$0xff]   ;;  %911 = vmatprep.subr.bf16.mxu1 %v983_v8  ;;  %v988_v13 = vld [vmem:[%s1135_s7 + $0x8] sm:$0xff]   ;;  %v992_v17 = vld [vmem:[%s1135_s7 + $0x10] sm:$0xff]  }
  0x2a   : > { %v985_v10 = vld [vmem:[%s1135_s7 + $0x80] sm:$0xff]   ;;  %884 = vmatpush3.bf16.msra.mxu0 %v984_v9  ;;  %v989_v14 = vld [vmem:[%s1135_s7 + $0x88] sm:$0xff]   ;;  %v993_v18 = vld [vmem:[%s1135_s7 + $0x90] sm:$0xff]  }
  0x2b   : > { %912 = vmatpush3.bf16.msra.mxu1 %v985_v10  ;;  %885 = vmatprep.subr.bf16.mxu0 %v986_v11  ;;  %v994_v19 = vld [vmem:[%s1135_s7 + $0x58] sm:$0xff]   ;;  %v998_v23 = vld [vmem:[%s1135_s7 + $0x60] sm:$0xff]   ;;  %v1002_v27 = vld [vmem:[%s1135_s7 + $0x68] sm:$0xff]  }
  0x2c   : > { %913 = vmatprep.subr.bf16.mxu1 %v987_v12  ;;  %v995_v20 = vld [vmem:[%s1135_s7 + $0xd8] sm:$0xff]   ;;  %v999_v24 = vld [vmem:[%s1135_s7 + $0xe0] sm:$0xff]   ;;  %v1003_v28 = vld [vmem:[%s1135_s7 + $0xe8] sm:$0xff]  }
  0x2d   : > { %v996_v21 = vld [vmem:[%s1135_s7 + $0x18] sm:$0xff]   ;;  %v1000_v25 = vld [vmem:[%s1135_s7 + $0x20] sm:$0xff]   ;;  %v1004_v29 = vld [vmem:[%s1135_s7 + $0x28] sm:$0xff]  }
  0x2e   : > { %886 = vmatpush3.bf16.msra.mxu0 %v988_v13  ;;  %v997_v22 = vld [vmem:[%s1135_s7 + $0x98] sm:$0xff]   ;;  %v1001_v26 = vld [vmem:[%s1135_s7 + $0xa0] sm:$0xff]   ;;  %v1005_v30 = vld [vmem:[%s1135_s7 + $0xa8] sm:$0xff]  }
  0x2f   : > { %914 = vmatpush3.bf16.msra.mxu1 %v989_v14  ;;  %887 = vmatprep.subr.bf16.mxu0 %v990_v15  ;;  %v1006_v31 = vld [vmem:[%s1135_s7 + $0x70] sm:$0xff]   ;;  %v1010_v35 = vld [vmem:[%s1135_s7 + $0x78] sm:$0xff]   ;;  %v293_v12 = vld [vmem:[#allocation2 + $0x10] sm:$0xff] }
  0x30   : > { %915 = vmatprep.subr.bf16.mxu1 %v991_v16  ;;  %v1007_v32 = vld [vmem:[%s1135_s7 + $0xf0] sm:$0xff]   ;;  %v1011_v36 = vld [vmem:[%s1135_s7 + $0xf8] sm:$0xff]  }
  0x31   : > { %v1008_v33 = vld [vmem:[%s1135_s7 + $0x30] sm:$0xff]   ;;  %v1012_v37 = vld [vmem:[%s1135_s7 + $0x38] sm:$0xff]  }
  0x32   : > { %888 = vmatpush3.bf16.msra.mxu0 %v992_v17  ;;  %v1009_v34 = vld [vmem:[%s1135_s7 + $0xb0] sm:$0xff]   ;;  %v1013_v38 = vld [vmem:[%s1135_s7 + $0xb8] sm:$0xff]   ;;  %v877_v17 = vld [vmem:[%s1208_s2] ss:$0 sm:$0xff] (!%p876_p11) }
  0x33   : > { %916 = vmatpush3.bf16.msra.mxu1 %v993_v18  ;;  %889 = vmatprep.subr.bf16.mxu0 %v994_v19  ;;  %v1014_v39 = vld [vmem:[%s1137_s8] ss:$16 sps:$4 sm:$0xff]   ;;  %v1016_v40 = vld [vmem:[%s1137_s8 + $0x4] ss:$16 sps:$4 sm:$0xff]   ;;  %v1017_v41 = vld [vmem:[%s1137_s8 + $0x8] ss:$16 sps:$4 sm:$0xff]  }
  0x34   : > { %917 = vmatprep.subr.bf16.mxu1 %v995_v20  ;;  %v1019_v42 = vld [vmem:[%s1137_s8 + $0xc] ss:$16 sps:$4 sm:$0xff]   ;;  %v298_v43 = vld [vmem:[%s1137_s8 + $0x20] sm:$0xff]  ;;  %622 = vmatprep.mubr.bf16.mxu0 %v1016_v40 }
  0x35   : > { %v841_v44 = vcombine.high %v298_v43, %v298_v43  ;;  %v299_v45 = vld [vmem:[%s1137_s8 + $0x28] sm:$0xff]  ;;  %670 = vmatprep.mubr.bf16.mxu1 %v1019_v42  ;;  %v840_v47 = vcombine.low %v298_v43, %v298_v43  ;;  %v292_v63 = vld [vmem:[#allocation2 + $0x8] sm:$0xff] }
  0x36   : > { %890 = vmatpush3.bf16.msra.mxu0 %v996_v21  ;;  %v843_v46 = vcombine.high %v299_v45, %v299_v45  ;;  %v842_v48 = vcombine.low %v299_v45, %v299_v45  ;;  %v291_v58 = vld [vmem:[#allocation2] sm:$0xff] }
  0x37   : > { %918 = vmatpush3.bf16.msra.mxu1 %v997_v22  ;;  %891 = vmatprep.subr.bf16.mxu0 %v998_v23 }
  0x38   : > { %919 = vmatprep.subr.bf16.mxu1 %v999_v24 }
  0x3a   : > { %892 = vmatpush3.bf16.msra.mxu0 %v1000_v25 }
  0x3b   : > { %920 = vmatpush3.bf16.msra.mxu1 %v1001_v26  ;;  %893 = vmatprep.subr.bf16.mxu0 %v1002_v27 }
  0x3c   : > { %921 = vmatprep.subr.bf16.mxu1 %v1003_v28 }
  0x3e   : > { %894 = vmatpush3.bf16.msra.mxu0 %v1004_v29 }
  0x3f   : > { %922 = vmatpush3.bf16.msra.mxu1 %v1005_v30  ;;  %895 = vmatprep.subr.bf16.mxu0 %v1006_v31 }
  0x40   : > { %923 = vmatprep.subr.bf16.mxu1 %v1007_v32 }
  0x42   : > { %896 = vmatpush3.bf16.msra.mxu0 %v1008_v33 }
  0x43   : > { %924 = vmatpush3.bf16.msra.mxu1 %v1009_v34  ;;  %897 = vmatprep.subr.bf16.mxu0 %v1010_v35 }
  0x44   : > { %925 = vmatprep.subr.bf16.mxu1 %v1011_v36 }
  0x46   : > { %898 = vmatpush3.bf16.msra.mxu0 %v1012_v37 }
  0x47   : > { %926 = vmatpush3.bf16.msra.mxu1 %v1013_v38 }
  0x49   : > { %623 = vmatmul.mubr.bf16.vlgmr.msra.gmra.mrb[0].mxu0 %v1014_v39 }
  0x4a   : > { %671 = vmatmul.mubr.bf16.vlgmr.msra.gmra.mrb[0].mxu1 %v1017_v41  ;;  %630 = vmatprep.mubr.bf16.mxu0 %v841_v44 }
  0x4b   : > { %678 = vmatprep.mubr.bf16.mxu1 %v843_v46 }
  0x51   : > { %631 = vmatmul.mubr.bf16.gmra.mrb[4].mxu0 %v840_v47 }
  0x52   : > { %679 = vmatmul.mubr.bf16.gmra.mrb[4].mxu1 %v842_v48 }
 0x11c   : > { %v899_v49 = vpop.f32.mrb[0].mxu0 }
 0x11d   : > { %v927_v50 = vpop.f32.mrb[0].mxu1  ;;  %v900_v51 = vpop.f32.mrb[1].mxu0 }
 0x11e   : > { %v901_v52 = vadd.f32 %v900_v51, %v899_v49  ;;  %v928_v53 = vpop.f32.mrb[1].mxu1  ;;  %v902_v54 = vpop.f32.mrb[2].mxu0 }
 0x11f   : > { %v929_v55 = vadd.f32 %v928_v53, %v927_v50  ;;  %v930_v56 = vpop.f32.mrb[2].mxu1  ;;  %v903_v57 = vpop.f32.mrb[3].mxu0 }
 0x120   : > { %v904_v59 = vadd.f32 %v903_v57, %v902_v54  ;;  %v931_v60 = vpop.f32.mrb[3].mxu1 }
 0x121   : > { %v673_v61 = vadd.f32 %v929_v55, %v901_v52  ;;  %v932_v62 = vadd.f32 %v931_v60, %v930_v56 }
 0x123   : > { %v686_v0 = vadd.f32 %v673_v61, %v291_v58  ;;  %v676_v1 = vadd.f32 %v932_v62, %v904_v59 }
 0x124   : > { %v905_v2 = vpop.f32.mrb[4].mxu0 }
 0x125   : > { %689 = vst [vmem:[#allocation2] sm:$0xff] %v686_v0  ;;  %v687_v3 = vadd.f32 %v676_v1, %v292_v63  ;;  %v933_v4 = vpop.f32.mrb[4].mxu1  ;;  %v906_v5 = vpop.f32.mrb[5].mxu0 }
 0x126   : > { %v907_v6 = vadd.f32 %v906_v5, %v905_v2  ;;  %v934_v7 = vpop.f32.mrb[5].mxu1  ;;  %v908_v8 = vpop.f32.mrb[6].mxu0 }
 0x127   : > { %690 = vst [vmem:[#allocation2 + $0x8] sm:$0xff] %v687_v3  ;;  %v935_v9 = vadd.f32 %v934_v7, %v933_v4  ;;  %v936_v10 = vpop.f32.mrb[6].mxu1  ;;  %v909_v11 = vpop.f32.mrb[7].mxu0  ;;  %695 = sbr.rel (%p876_p11) target bundleno = 314 (0x13a), region = 63 }
 0x128   : > { %v937_v13 = vpop.f32.mrb[7].mxu1 }
 0x129   : > { %v681_v14 = vadd.f32 %v935_v9, %v907_v6 }
 0x12b   : > { %v688_v15 = vadd.f32 %v681_v14, %v293_v12 }
 0x12c   : > { %v696_v16 = vld [vmem:[#allocation2] sm:$0xff] (!%p876_p11) }
 0x12d   : > { %691 = vst [vmem:[#allocation2 + $0x10] sm:$0xff] %v688_v15  ;;  %v706_v19 = vadd.f32 (!%p876_p11), %v877_v17, %v696_v16 }
 0x12e   : > { %v697_v18 = vld [vmem:[#allocation2 + $0x8] sm:$0xff] }
 0x12f   : > { %v707_v20 = vadd.f32 %v877_v17, %v697_v18  ;;  %v709_v23 = vmax.f32 %v706_v19, 0.0 }
 0x131   : > { %v710_v24 = vmax.f32 %v707_v20, 0.0  ;;  %712 = vst [vmem:[%s1209_s3] sm:$0xff] %v709_v23 }
 0x133   : > { %713 = vst [vmem:[%s1209_s3 + $0x8] sm:$0xff] %v710_v24 }
 0x134   : > { %v698_v21 = vld [vmem:[#allocation2 + $0x10] sm:$0xff] }
 0x135   : > { %v708_v22 = vadd.f32 %v877_v17, %v698_v21 }
 0x137   : > { %v711_v25 = vmax.f32 %v708_v22, 0.0 }
 0x139   : > { %714 = vst [vmem:[%s1209_s3 + $0x10] sm:$0xff] %v711_v25 }
 0x13a PF: > { %s13_s16 = sadd.s32 1, %s1062_s16   ;;  %s1210_s12 = smov %s1050_s13 }
 0x13b   : > { %p10_p12 = scmp.ge.s32.totalorder %s13_s16, 4   ;;  %s1211_s13 = smov %s1120_s20 }
 0x13c   : > { %s1212_s14 = smov %s1058_s15  ;;  %s1213_s15 = smov %s1215_s17 }
 0x13d   :  { %12 = sbr.rel (!%p10_p12) target bundleno = 3 (0x3), region = 104 }

// kernel: dqn_forward.8
= control target key start
LH: loop header
LB: loop body
LE: loop exit
PB: predicated region body
PF: predicated region fallthrough
CT: control target
= control target key end

     0   :  { %s941_s12 = smov 0   ;;  %s943_s13 = smov 0   ;;  %s1024_s0 = inlined_call_operand.vmem [shape: bf16[8,1024], index: 0, kind: input, shape index: {}]   ;;  %s1025_s1 = inlined_call_operand.vmem [shape: bf16[1024,128], index: 1, kind: input, shape index: {}]   ;;  %s1026_s2 = inlined_call_operand.vmem [shape: f32[1,128], index: 2, kind: input, shape index: {}]   ;;  %s1027_s3 = inlined_call_operand.vmem [shape: f32[8,128], index: 3, kind: output, shape index: {}]  }
   0x1   :  { %s945_s14 = smov 0  }
   0x2 LB: > { %s25_s15 = sadd.s32 1, %s914_s13  ;;  %p744_p0 = scmp.ge.s32.totalorder %s918_s14, 1  ;;  %s918_s14 = sphi %s945_s14, %s13_s14   ;;  %s914_s13 = sphi %s943_s13, %s1029_s13   ;;  %s910_s12 = sphi %s941_s12, %s1028_s12  }
   0x3   : > { %p26_p1 = scmp.ge.s32.totalorder %s25_s15, 2  ;;  %p189_p2 = scmp.lt.s32.totalorder %s918_s14, 3 }
   0x5   : > { %s1031_s15 = smov (%p26_p1, %s25_s15), 0  ;;  %p190_p3 = pnand %p744_p0, %p189_p2 }
   0x6   : > { %s745_s16 = sshll.u32 (!%p190_p3), %s910_s12, 2  ;;  %s747_s17 = sshll.u32 (!%p190_p3), %s910_s12, 6 }
   0x7   : > { %193 = sbr.rel (%p190_p3) target bundleno = 291 (0x123), region = 32  ;;  %p233_p4 = scmp.lt.s32.totalorder (!%p190_p3), %s745_s16, 7 }
   0x8   : > { %p241_p5 = scmp.lt.s32.totalorder (!%p190_p3), %s747_s17, 127  ;;  %p749_p6 = scmp.ne.s32.totalorder (!%p190_p3), %s910_s12, 0 }
   0xe   : > { %s1033_s16 = smov (!%p233_p4, %s745_s16), 7  ;;  %s1035_s17 = smov (!%p241_p5, %s747_s17), 127 }
   0xf   : > { %s746_s18 = sshll.u32 %s1033_s16, 2  ;;  %s748_s22 = sshll.u32 %s1035_s17, 2  ;;  %v920_v0 = vmov (!%p749_p6), 0.0  }
  0x10   : > { %s966_s21 = scalar_lea.vmem %s1024_s0, %s746_s18  ;;  %s971_s25 = scalar_lea.vmem %s1025_s1, %s748_s22  ;;  %264 = vst [vmem:[#allocation2] sm:$0xff] (!%p749_p6), %v920_v0 }
  0x11   : > { %263 = sbr.rel (%p749_p6) target bundleno = 24 (0x18), region = 36 }
  0x18 PF: > { %v860_v1 = vld [vmem:[%s971_s25 + $0x40] sm:$0xff]   ;;  %v864_v5 = vld [vmem:[%s971_s25 + $0x48] sm:$0xff]   ;;  %v868_v9 = vld [vmem:[%s971_s25 + $0x50] sm:$0xff]   ;;  %p786_p7 = scmp.ne.s32.totalorder %s910_s12, 1 }
  0x19   : > { %v861_v2 = vld [vmem:[%s971_s25 + $0xc0] sm:$0xff]   ;;  %791 = vmatprep.subr.bf16.mxu0 %v860_v1  ;;  %v865_v6 = vld [vmem:[%s971_s25 + $0xc8] sm:$0xff]   ;;  %v869_v10 = vld [vmem:[%s971_s25 + $0xd0] sm:$0xff]  }
  0x1a   : > { %v862_v3 = vld [vmem:[%s971_s25] sm:$0xff]   ;;  %813 = vmatprep.subr.bf16.mxu1 %v861_v2  ;;  %v866_v7 = vld [vmem:[%s971_s25 + $0x8] sm:$0xff]   ;;  %v870_v11 = vld [vmem:[%s971_s25 + $0x10] sm:$0xff]  }
  0x1b   : > { %v863_v4 = vld [vmem:[%s971_s25 + $0x80] sm:$0xff]   ;;  %792 = vmatpush3.bf16.msra.mxu0 %v862_v3  ;;  %v867_v8 = vld [vmem:[%s971_s25 + $0x88] sm:$0xff]   ;;  %v871_v12 = vld [vmem:[%s971_s25 + $0x90] sm:$0xff]  }
  0x1c   : > { %814 = vmatpush3.bf16.msra.mxu1 %v863_v4  ;;  %793 = vmatprep.subr.bf16.mxu0 %v864_v5  ;;  %v872_v13 = vld [vmem:[%s971_s25 + $0x58] sm:$0xff]   ;;  %v876_v17 = vld [vmem:[%s971_s25 + $0x60] sm:$0xff]   ;;  %v880_v21 = vld [vmem:[%s971_s25 + $0x68] sm:$0xff]  }
  0x1d   : > { %815 = vmatprep.subr.bf16.mxu1 %v865_v6  ;;  %v873_v14 = vld [vmem:[%s971_s25 + $0xd8] sm:$0xff]   ;;  %v877_v18 = vld [vmem:[%s971_s25 + $0xe0] sm:$0xff]   ;;  %v881_v22 = vld [vmem:[%s971_s25 + $0xe8] sm:$0xff]  }
  0x1e   : > { %v874_v15 = vld [vmem:[%s971_s25 + $0x18] sm:$0xff]   ;;  %v878_v19 = vld [vmem:[%s971_s25 + $0x20] sm:$0xff]   ;;  %v882_v23 = vld [vmem:[%s971_s25 + $0x28] sm:$0xff]  }
  0x1f   : > { %794 = vmatpush3.bf16.msra.mxu0 %v866_v7  ;;  %v875_v16 = vld [vmem:[%s971_s25 + $0x98] sm:$0xff]   ;;  %v879_v20 = vld [vmem:[%s971_s25 + $0xa0] sm:$0xff]   ;;  %v883_v24 = vld [vmem:[%s971_s25 + $0xa8] sm:$0xff]  }
  0x20   : > { %816 = vmatpush3.bf16.msra.mxu1 %v867_v8  ;;  %795 = vmatprep.subr.bf16.mxu0 %v868_v9  ;;  %v884_v25 = vld [vmem:[%s971_s25 + $0x70] sm:$0xff]   ;;  %v888_v29 = vld [vmem:[%s971_s25 + $0x78] sm:$0xff]   ;;  %v266_v33 = vld [vmem:[%s966_s21] sm:$0xff] }
  0x21   : > { %817 = vmatprep.subr.bf16.mxu1 %v869_v10  ;;  %v885_v26 = vld [vmem:[%s971_s25 + $0xf0] sm:$0xff]   ;;  %v889_v30 = vld [vmem:[%s971_s25 + $0xf8] sm:$0xff]   ;;  %v267_v34 = vld [vmem:[%s966_s21 + $0x8] sm:$0xff]  ;;  %v750_v35 = vcombine.low %v266_v33, %v266_v33  ;;  %v751_v36 = vcombine.high %v266_v33, %v266_v33 }
  0x22   : > { %v886_v27 = vld [vmem:[%s971_s25 + $0x30] sm:$0xff]   ;;  %v890_v31 = vld [vmem:[%s971_s25 + $0x38] sm:$0xff]   ;;  %v752_v37 = vcombine.low %v267_v34, %v267_v34  ;;  %v753_v38 = vcombine.high %v267_v34, %v267_v34  ;;  %v787_v53 = vld [vmem:[%s1026_s2] ss:$0 sm:$0xff] (!%p786_p7) }
  0x23   : > { %796 = vmatpush3.bf16.msra.mxu0 %v870_v11  ;;  %v887_v28 = vld [vmem:[%s971_s25 + $0xb0] sm:$0xff]   ;;  %v891_v32 = vld [vmem:[%s971_s25 + $0xb8] sm:$0xff]   ;;  %570 = vmatprep.mubr.bf16.mxu0 %v751_v36 }
  0x24   : > { %818 = vmatpush3.bf16.msra.mxu1 %v871_v12  ;;  %797 = vmatprep.subr.bf16.mxu0 %v872_v13  ;;  %v265_v47 = vld [vmem:[#allocation2] sm:$0xff] }
  0x25   : > { %819 = vmatprep.subr.bf16.mxu1 %v873_v14  ;;  %610 = vmatprep.mubr.bf16.mxu1 %v753_v38 }
  0x27   : > { %798 = vmatpush3.bf16.msra.mxu0 %v874_v15 }
  0x28   : > { %820 = vmatpush3.bf16.msra.mxu1 %v875_v16  ;;  %799 = vmatprep.subr.bf16.mxu0 %v876_v17 }
  0x29   : > { %821 = vmatprep.subr.bf16.mxu1 %v877_v18 }
  0x2b   : > { %800 = vmatpush3.bf16.msra.mxu0 %v878_v19 }
  0x2c   : > { %822 = vmatpush3.bf16.msra.mxu1 %v879_v20  ;;  %801 = vmatprep.subr.bf16.mxu0 %v880_v21 }
  0x2d   : > { %823 = vmatprep.subr.bf16.mxu1 %v881_v22 }
  0x2f   : > { %802 = vmatpush3.bf16.msra.mxu0 %v882_v23 }
  0x30   : > { %824 = vmatpush3.bf16.msra.mxu1 %v883_v24  ;;  %803 = vmatprep.subr.bf16.mxu0 %v884_v25 }
  0x31   : > { %825 = vmatprep.subr.bf16.mxu1 %v885_v26 }
  0x33   : > { %804 = vmatpush3.bf16.msra.mxu0 %v886_v27 }
  0x34   : > { %826 = vmatpush3.bf16.msra.mxu1 %v887_v28  ;;  %805 = vmatprep.subr.bf16.mxu0 %v888_v29 }
  0x35   : > { %827 = vmatprep.subr.bf16.mxu1 %v889_v30 }
  0x37   : > { %806 = vmatpush3.bf16.msra.mxu0 %v890_v31 }
  0x38   : > { %828 = vmatpush3.bf16.msra.mxu1 %v891_v32 }
  0x3a   : > { %571 = vmatmul.mubr.bf16.vlgmr.msra.gmra.mrb[0].mxu0 %v750_v35 }
  0x3b   : > { %611 = vmatmul.mubr.bf16.vlgmr.msra.gmra.mrb[0].mxu1 %v752_v37 }
 0x10d   : > { %v807_v39 = vpop.f32.mrb[0].mxu0 }
 0x10e   : > { %v829_v40 = vpop.f32.mrb[0].mxu1  ;;  %v808_v41 = vpop.f32.mrb[1].mxu0 }
 0x10f   : > { %v830_v42 = vpop.f32.mrb[1].mxu1  ;;  %v809_v43 = vadd.f32 %v808_v41, %v807_v39  ;;  %v810_v45 = vpop.f32.mrb[2].mxu0 }
 0x110   : > { %v831_v44 = vadd.f32 %v830_v42, %v829_v40  ;;  %v832_v46 = vpop.f32.mrb[2].mxu1  ;;  %v811_v48 = vpop.f32.mrb[3].mxu0  ;;  %623 = sbr.rel (%p786_p7) target bundleno = 291 (0x123), region = 40 }
 0x111   : > { %v833_v49 = vpop.f32.mrb[3].mxu1 }
 0x112   : > { %v613_v50 = vadd.f32 %v831_v44, %v809_v43 }
 0x114   : > { %v618_v51 = vadd.f32 %v613_v50, %v265_v47 }
 0x116   : > { %619 = vst [vmem:[#allocation2] sm:$0xff] %v618_v51 }
 0x11d   : > { %v624_v52 = vld [vmem:[#allocation2] sm:$0xff] }
 0x11e   : > { %v632_v54 = vadd.f32 %v787_v53, %v624_v52 }
 0x120   : > { %v633_v55 = vmax.f32 %v632_v54, 0.0 }
 0x122   : > { %634 = vst [vmem:[%s1027_s3] sm:$0xff] %v633_v55 }
 0x123 PF: > { %s13_s14 = sadd.s32 1, %s918_s14   ;;  %s1028_s12 = smov %s914_s13 }
 0x124   : > { %p10_p8 = scmp.ge.s32.totalorder %s13_s14, 4   ;;  %s1029_s13 = smov %s1031_s15 }
 0x126   :  { %12 = sbr.rel (!%p10_p8) target bundleno = 2 (0x2), region = 76 }

// kernel: dqn_forward.9
= control target key start
LH: loop header
LB: loop body
LE: loop exit
PB: predicated region body
PF: predicated region fallthrough
CT: control target
= control target key end

     0   :  { %v1296_v1 = vmov 0   ;;  %s1712_s1 = inlined_call_operand.vmem [shape: bf16[128,512], index: 1, kind: input, shape index: {}]   ;;  %s1713_s3 = inlined_call_operand.vmem [shape: bf16[512,256], index: 3, kind: input, shape index: {}]   ;;  %s1714_s0 = inlined_call_operand.vmem [shape: bf16[8,128], index: 0, kind: input, shape index: {}]   ;;  %s1715_s5 = inlined_call_operand.vmem [shape: bf16[256,128], index: 5, kind: input, shape index: {}]   ;;  %s1716_s2 = inlined_call_operand.vmem [shape: f32[1,512], index: 2, kind: input, shape index: {}]   ;;  %s1717_s4 = inlined_call_operand.vmem [shape: f32[1,256], index: 4, kind: input, shape index: {}]   ;;  %s1718_s6 = inlined_call_operand.vmem [shape: f32[1,128], index: 6, kind: input, shape index: {}]   ;;  %s1719_s7 = inlined_call_operand.vmem [shape: f32[8,128], index: 7, kind: output, shape index: {}]  }
   0x1   :  { %v1136_v0 = vld [vmem:[%s1712_s1 + $0x4] ss:$16 sps:$4 sm:$0xff]   ;;  %274 = vmatprep.mubr.bf16.mxu1 %v1296_v1  ;;  %v1138_v2 = vld [vmem:[%s1712_s1] ss:$16 sps:$4 sm:$0xff]   ;;  %v1162_v22 = vld [vmem:[%s1712_s1 + $0xc] ss:$16 sps:$4 sm:$0xff]  }
   0x2   :  { %242 = vmatprep.subr.bf16.mxu1 %v1136_v0  ;;  %v1139_v3 = vld [vmem:[%s1712_s1 + $0x24] ss:$16 sps:$4 sm:$0xff]   ;;  %v1141_v4 = vld [vmem:[%s1712_s1 + $0x20] ss:$16 sps:$4 sm:$0xff]   ;;  %v1160_v26 = vld [vmem:[%s1712_s1 + $0x8] ss:$16 sps:$4 sm:$0xff]  }
   0x3   :  { %243 = vmatpush1.bf16.msra.mxu1 %v1138_v2  ;;  %v1142_v5 = vld [vmem:[%s1712_s1 + $0x44] ss:$16 sps:$4 sm:$0xff]   ;;  %v1144_v6 = vld [vmem:[%s1712_s1 + $0x40] ss:$16 sps:$4 sm:$0xff]   ;;  %v1165_v27 = vld [vmem:[%s1712_s1 + $0x2c] ss:$16 sps:$4 sm:$0xff]  }
   0x4   :  { %244 = vmatprep.subr.bf16.mxu1 %v1139_v3  ;;  %v1145_v7 = vld [vmem:[%s1712_s1 + $0x64] ss:$16 sps:$4 sm:$0xff]   ;;  %v1147_v8 = vld [vmem:[%s1712_s1 + $0x60] ss:$16 sps:$4 sm:$0xff]   ;;  %v1163_v30 = vld [vmem:[%s1712_s1 + $0x28] ss:$16 sps:$4 sm:$0xff]  }
   0x5   :  { %v1148_v9 = vld [vmem:[%s1712_s1 + $0x84] ss:$16 sps:$4 sm:$0xff]   ;;  %v1150_v10 = vld [vmem:[%s1712_s1 + $0x80] ss:$16 sps:$4 sm:$0xff]   ;;  %v1168_v31 = vld [vmem:[%s1712_s1 + $0x4c] ss:$16 sps:$4 sm:$0xff]  }
   0x6   :  { %v1151_v11 = vld [vmem:[%s1712_s1 + $0xa4] ss:$16 sps:$4 sm:$0xff]   ;;  %v1153_v12 = vld [vmem:[%s1712_s1 + $0xa0] ss:$16 sps:$4 sm:$0xff]   ;;  %v1166_v33 = vld [vmem:[%s1712_s1 + $0x48] ss:$16 sps:$4 sm:$0xff]  }
   0x7   :  { %245 = vmatpush1.bf16.msra.mxu1 %v1141_v4  ;;  %v1154_v13 = vld [vmem:[%s1712_s1 + $0xc4] ss:$16 sps:$4 sm:$0xff]   ;;  %v1156_v14 = vld [vmem:[%s1712_s1 + $0xc0] ss:$16 sps:$4 sm:$0xff]   ;;  %v1171_v35 = vld [vmem:[%s1712_s1 + $0x6c] ss:$16 sps:$4 sm:$0xff]  }
   0x8   :  { %246 = vmatprep.subr.bf16.mxu1 %v1142_v5  ;;  %v1184_v15 = vld [vmem:[%s1713_s3 + $0x4] ss:$8 sps:$4 sm:$0xff]   ;;  %v1186_v16 = vld [vmem:[%s1713_s3] ss:$8 sps:$4 sm:$0xff]   ;;  %v1187_v17 = vld [vmem:[%s1713_s3 + $0x14] ss:$8 sps:$4 sm:$0xff]  }
   0x9   :  { %v1157_v18 = vld [vmem:[%s1712_s1 + $0xe4] ss:$16 sps:$4 sm:$0xff]   ;;  %728 = vmatprep.subr.bf16.mxu0 %v1184_v15  ;;  %v1189_v19 = vld [vmem:[%s1713_s3 + $0x10] ss:$8 sps:$4 sm:$0xff]   ;;  %v1192_v23 = vld [vmem:[%s1713_s3 + $0x20] ss:$8 sps:$4 sm:$0xff]   ;;  %v62_v15 = vlaneseq }
   0xa   :  { %729 = vmatpush1.bf16.msra.mxu0 %v1186_v16  ;;  %v1190_v20 = vld [vmem:[%s1713_s3 + $0x24] ss:$8 sps:$4 sm:$0xff]   ;;  %v1159_v21 = vld [vmem:[%s1712_s1 + $0xe0] ss:$16 sps:$4 sm:$0xff]   ;;  %v1193_v25 = vld [vmem:[%s1713_s3 + $0x34] ss:$8 sps:$4 sm:$0xff]  }
   0xb   :  { %247 = vmatpush1.bf16.msra.mxu1 %v1144_v6  ;;  %730 = vmatprep.subr.bf16.mxu0 %v1187_v17  ;;  %v1409_v24 = vld [vmem:[%s1714_s0] sm:$0xf]  ;;  %v1195_v28 = vld [vmem:[%s1713_s3 + $0x30] ss:$8 sps:$4 sm:$0xff]   ;;  %v1196_v29 = vld [vmem:[%s1713_s3 + $0x44] ss:$8 sps:$4 sm:$0xff]  }
   0xc   :  { %248 = vmatprep.subr.bf16.mxu1 %v1145_v7  ;;  %v1198_v32 = vld [vmem:[%s1713_s3 + $0x40] ss:$8 sps:$4 sm:$0xff]   ;;  %v1199_v34 = vld [vmem:[%s1713_s3 + $0x54] ss:$8 sps:$4 sm:$0xff]   ;;  %v1201_v36 = vld [vmem:[%s1713_s3 + $0x50] ss:$8 sps:$4 sm:$0xff]  }
   0xd   :  { %v1202_v37 = vld [vmem:[%s1713_s3 + $0x64] ss:$8 sps:$4 sm:$0xff]   ;;  %v1169_v38 = vld [vmem:[%s1712_s1 + $0x68] ss:$16 sps:$4 sm:$0xff]   ;;  %v1205_v41 = vld [vmem:[%s1713_s3 + $0x74] ss:$8 sps:$4 sm:$0xff]  }
   0xe   :  { %731 = vmatpush1.bf16.msra.mxu0 %v1189_v19  ;;  %v1174_v39 = vld [vmem:[%s1712_s1 + $0x8c] ss:$16 sps:$4 sm:$0xff]   ;;  %v1204_v40 = vld [vmem:[%s1713_s3 + $0x60] ss:$8 sps:$4 sm:$0xff]   ;;  %v1207_v44 = vld [vmem:[%s1713_s3 + $0x70] ss:$8 sps:$4 sm:$0xff]  }
   0xf   :  { %249 = vmatpush1.bf16.msra.mxu1 %v1147_v8  ;;  %732 = vmatprep.subr.bf16.mxu0 %v1190_v20  ;;  %v1172_v42 = vld [vmem:[%s1712_s1 + $0x88] ss:$16 sps:$4 sm:$0xff]   ;;  %v1177_v43 = vld [vmem:[%s1712_s1 + $0xac] ss:$16 sps:$4 sm:$0xff]   ;;  %v1280_v3 = vld [vmem:[%s1715_s5 + $0x40] sm:$0xff]   ;;  %v1575_v16 = vshrl.u32 %v62_v15, 7 }
  0x10   :  { %250 = vmatprep.subr.bf16.mxu1 %v1148_v9  ;;  %v1208_v45 = vld [vmem:[%s1713_s3 + $0x84] ss:$8 sps:$4 sm:$0xff]   ;;  %v1175_v46 = vld [vmem:[%s1712_s1 + $0xa8] ss:$16 sps:$4 sm:$0xff]   ;;  %v1211_v49 = vld [vmem:[%s1713_s3 + $0x94] ss:$8 sps:$4 sm:$0xff]  }
  0x11   :  { %v1180_v47 = vld [vmem:[%s1712_s1 + $0xcc] ss:$16 sps:$4 sm:$0xff]   ;;  %v1210_v48 = vld [vmem:[%s1713_s3 + $0x80] ss:$8 sps:$4 sm:$0xff]   ;;  %v1213_v52 = vld [vmem:[%s1713_s3 + $0x90] ss:$8 sps:$4 sm:$0xff]  }
  0x12   :  { %733 = vmatpush1.bf16.msra.mxu0 %v1192_v23  ;;  %v1178_v50 = vld [vmem:[%s1712_s1 + $0xc8] ss:$16 sps:$4 sm:$0xff]   ;;  %v1183_v51 = vld [vmem:[%s1712_s1 + $0xec] ss:$16 sps:$4 sm:$0xff]   ;;  %v1281_v4 = vld [vmem:[%s1715_s5] sm:$0xff]   ;;  %v64_v17 = vsub.s32 0, %v1575_v16 }
  0x13   :  { %251 = vmatpush1.bf16.msra.mxu1 %v1150_v10  ;;  %734 = vmatprep.subr.bf16.mxu0 %v1193_v25  ;;  %v1214_v53 = vld [vmem:[%s1713_s3 + $0xa4] ss:$8 sps:$4 sm:$0xff]   ;;  %v1181_v54 = vld [vmem:[%s1712_s1 + $0xe8] ss:$16 sps:$4 sm:$0xff]   ;;  %v1217_v56 = vld [vmem:[%s1713_s3 + $0xb4] ss:$8 sps:$4 sm:$0xff]  }
  0x14   :  { %252 = vmatprep.subr.bf16.mxu1 %v1151_v11  ;;  %v1216_v55 = vld [vmem:[%s1713_s3 + $0xa0] ss:$8 sps:$4 sm:$0xff]   ;;  %v1219_v57 = vld [vmem:[%s1713_s3 + $0xb0] ss:$8 sps:$4 sm:$0xff]   ;;  %v1220_v58 = vld [vmem:[%s1713_s3 + $0xc4] ss:$8 sps:$4 sm:$0xff]  }
  0x15   :  { %v1222_v59 = vld [vmem:[%s1713_s3 + $0xc0] ss:$8 sps:$4 sm:$0xff]   ;;  %v1223_v60 = vld [vmem:[%s1713_s3 + $0xd4] ss:$8 sps:$4 sm:$0xff]   ;;  %v1225_v61 = vld [vmem:[%s1713_s3 + $0xd0] ss:$8 sps:$4 sm:$0xff]  }
  0x16   :  { %735 = vmatpush1.bf16.msra.mxu0 %v1195_v28  ;;  %v1226_v62 = vld [vmem:[%s1713_s3 + $0xe4] ss:$8 sps:$4 sm:$0xff]   ;;  %v1228_v63 = vld [vmem:[%s1713_s3 + $0xe0] ss:$8 sps:$4 sm:$0xff]   ;;  %v1229_v0 = vld [vmem:[%s1713_s3 + $0xf4] ss:$8 sps:$4 sm:$0xff]  }
  0x17   :  { %253 = vmatpush1.bf16.msra.mxu1 %v1153_v12  ;;  %736 = vmatprep.subr.bf16.mxu0 %v1196_v29  ;;  %v1234_v2 = vld [vmem:[%s1713_s3 + $0x104] ss:$8 sps:$4 sm:$0xff]   ;;  %v1284_v7 = vld [vmem:[%s1715_s5 + $0x50] sm:$0xff]   ;;  %v1286_v9 = vld [vmem:[%s1715_s5 + $0x58] sm:$0xff]   ;;  %v68_v19 = vsub.s32 1, %v1575_v16 }
  0x18   :  { %254 = vmatprep.subr.bf16.mxu1 %v1154_v13  ;;  %v1282_v5 = vld [vmem:[%s1715_s5 + $0x48] sm:$0xff]   ;;  %v1285_v8 = vld [vmem:[%s1715_s5 + $0x10] sm:$0xff]   ;;  %v1287_v10 = vld [vmem:[%s1715_s5 + $0x18] sm:$0xff]  }
  0x19   :  { %v1283_v6 = vld [vmem:[%s1715_s5 + $0x8] sm:$0xff]   ;;  %v1288_v11 = vld [vmem:[%s1715_s5 + $0x60] sm:$0xff]   ;;  %v1294_v15 = vld [vmem:[%s1715_s5 + $0x78] sm:$0xff]  }
  0x1a   :  { %737 = vmatpush1.bf16.msra.mxu0 %v1198_v32  ;;  %v1289_v12 = vld [vmem:[%s1715_s5 + $0x20] sm:$0xff]   ;;  %v1290_v13 = vld [vmem:[%s1715_s5 + $0x68] sm:$0xff]  }
  0x1b   :  { %255 = vmatpush1.bf16.msra.mxu1 %v1156_v14  ;;  %738 = vmatprep.subr.bf16.mxu0 %v1199_v34  ;;  %v1291_v14 = vld [vmem:[%s1715_s5 + $0x28] sm:$0xff]   ;;  %v1235_v34 = vld [vmem:[%s1713_s3 + $0x110] ss:$8 sps:$4 sm:$0xff]  }
  0x1c   :  { %256 = vmatprep.subr.bf16.mxu1 %v1157_v18  ;;  %v1581_v18 = vld [vmem:[%s1716_s2] sm:$0xf] }
  0x1d   :  { %v65_v20 = vrot.slane %v1581_v18, %v64_v17 }
  0x1e   :  { %739 = vmatpush1.bf16.msra.mxu0 %v1201_v36  ;;  %v1238_v36 = vld [vmem:[%s1713_s3 + $0x120] ss:$8 sps:$4 sm:$0xff]  }
  0x1f   :  { %257 = vmatpush1.bf16.msra.mxu1 %v1159_v21  ;;  %740 = vmatprep.subr.bf16.mxu0 %v1202_v37  ;;  %v69_v21 = vrot.slane %v1581_v18, %v68_v19  ;;  %v1243_v37 = vld [vmem:[%s1713_s3 + $0x134] ss:$8 sps:$4 sm:$0xff]  }
  0x20   :  { %283 = vmatprep.subr.bf16.mxu1 %v1162_v22 }
  0x22   :  { %275 = vmatmul.mubr.bf16.vlgmr.msra.gmra.mrb[0].mxu1 %v1409_v24  ;;  %741 = vmatpush1.bf16.msra.mxu0 %v1204_v40  ;;  %v1244_v40 = vld [vmem:[%s1713_s3 + $0x140] ss:$8 sps:$4 sm:$0xff]  }
  0x23   :  { %284 = vmatpush1.bf16.msra.mxu1 %v1160_v26  ;;  %315 = vmatprep.mubr.bf16.mxu1 %v1296_v1  ;;  %v1231_v1 = vld [vmem:[%s1713_s3 + $0xf0] ss:$8 sps:$4 sm:$0xff]  }
  0x24   :  { %285 = vmatprep.subr.bf16.mxu1 %v1165_v27  ;;  %742 = vmatprep.subr.bf16.mxu0 %v1205_v41  ;;  %v1249_v41 = vld [vmem:[%s1713_s3 + $0x154] ss:$8 sps:$4 sm:$0xff]  }
  0x26   :  { %743 = vmatpush1.bf16.msra.mxu0 %v1207_v44  ;;  %v1252_v44 = vld [vmem:[%s1713_s3 + $0x164] ss:$8 sps:$4 sm:$0xff]  }
  0x27   :  { %286 = vmatpush1.bf16.msra.mxu1 %v1163_v30  ;;  %744 = vmatprep.subr.bf16.mxu0 %v1208_v45  ;;  %v1250_v45 = vld [vmem:[%s1713_s3 + $0x160] ss:$8 sps:$4 sm:$0xff]  }
  0x28   :  { %287 = vmatprep.subr.bf16.mxu1 %v1168_v31  ;;  %v1232_v31 = vld [vmem:[%s1713_s3 + $0x100] ss:$8 sps:$4 sm:$0xff]  }
  0x2a   :  { %745 = vmatpush1.bf16.msra.mxu0 %v1210_v48 }
  0x2b   :  { %288 = vmatpush1.bf16.msra.mxu1 %v1166_v33  ;;  %746 = vmatprep.subr.bf16.mxu0 %v1211_v49  ;;  %v1237_v33 = vld [vmem:[%s1713_s3 + $0x114] ss:$8 sps:$4 sm:$0xff]  }
  0x2c   :  { %289 = vmatprep.subr.bf16.mxu1 %v1171_v35  ;;  %v1240_v35 = vld [vmem:[%s1713_s3 + $0x124] ss:$8 sps:$4 sm:$0xff]  }
  0x2e   :  { %747 = vmatpush1.bf16.msra.mxu0 %v1213_v52 }
  0x2f   :  { %290 = vmatpush1.bf16.msra.mxu1 %v1169_v38  ;;  %748 = vmatprep.subr.bf16.mxu0 %v1214_v53  ;;  %v1241_v38 = vld [vmem:[%s1713_s3 + $0x130] ss:$8 sps:$4 sm:$0xff]   ;;  %v1258_v53 = vld [vmem:[%s1713_s3 + $0x184] ss:$8 sps:$4 sm:$0xff]  }
  0x30   :  { %291 = vmatprep.subr.bf16.mxu1 %v1174_v39  ;;  %v1246_v39 = vld [vmem:[%s1713_s3 + $0x144] ss:$8 sps:$4 sm:$0xff]  }
  0x32   :  { %749 = vmatpush1.bf16.msra.mxu0 %v1216_v55 }
  0x33   :  { %292 = vmatpush1.bf16.msra.mxu1 %v1172_v42  ;;  %750 = vmatprep.subr.bf16.mxu0 %v1217_v56  ;;  %v1247_v42 = vld [vmem:[%s1713_s3 + $0x150] ss:$8 sps:$4 sm:$0xff]   ;;  %v1256_v56 = vld [vmem:[%s1713_s3 + $0x180] ss:$8 sps:$4 sm:$0xff]  }
  0x34   :  { %293 = vmatprep.subr.bf16.mxu1 %v1177_v43  ;;  %v76_v43 = vsub.s32 3, %v1575_v16 }
  0x36   :  { %751 = vmatpush1.bf16.msra.mxu0 %v1219_v57 }
  0x37   :  { %294 = vmatpush1.bf16.msra.mxu1 %v1175_v46  ;;  %752 = vmatprep.subr.bf16.mxu0 %v1220_v58  ;;  %v77_v46 = vrot.slane %v1581_v18, %v76_v43  ;;  %v1261_v58 = vld [vmem:[%s1713_s3 + $0x194] ss:$8 sps:$4 sm:$0xff]  }
  0x38   :  { %295 = vmatprep.subr.bf16.mxu1 %v1180_v47  ;;  %v1255_v47 = vld [vmem:[%s1713_s3 + $0x174] ss:$8 sps:$4 sm:$0xff]  }
  0x3a   :  { %753 = vmatpush1.bf16.msra.mxu0 %v1222_v59  ;;  %v1259_v59 = vld [vmem:[%s1713_s3 + $0x190] ss:$8 sps:$4 sm:$0xff]  }
  0x3b   :  { %296 = vmatpush1.bf16.msra.mxu1 %v1178_v50  ;;  %754 = vmatprep.subr.bf16.mxu0 %v1223_v60  ;;  %v1253_v50 = vld [vmem:[%s1713_s3 + $0x170] ss:$8 sps:$4 sm:$0xff]   ;;  %v1264_v60 = vld [vmem:[%s1713_s3 + $0x1a4] ss:$8 sps:$4 sm:$0xff]  }
  0x3c   :  { %297 = vmatprep.subr.bf16.mxu1 %v1183_v51 }
  0x3e   :  { %755 = vmatpush1.bf16.msra.mxu0 %v1225_v61  ;;  %v1262_v61 = vld [vmem:[%s1713_s3 + $0x1a0] ss:$8 sps:$4 sm:$0xff]  }
  0x3f   :  { %298 = vmatpush1.bf16.msra.mxu1 %v1181_v54  ;;  %756 = vmatprep.subr.bf16.mxu0 %v1226_v62  ;;  %v1267_v62 = vld [vmem:[%s1713_s3 + $0x1b4] ss:$8 sps:$4 sm:$0xff]  }
  0x40   :  { %1107 = vmatprep.subr.bf16.mxu1 %v1280_v3  ;;  %v1273_v3 = vld [vmem:[%s1713_s3 + $0x1d4] ss:$8 sps:$4 sm:$0xff]  }
  0x42   :  { %316 = vmatmul.mubr.bf16.vlgmr.msra.gmra.mrb[4].mxu1 %v1409_v24  ;;  %757 = vmatpush1.bf16.msra.mxu0 %v1228_v63  ;;  %v1265_v63 = vld [vmem:[%s1713_s3 + $0x1b0] ss:$8 sps:$4 sm:$0xff]  }
  0x43   :  { %758 = vmatprep.subr.bf16.mxu0 %v1229_v0  ;;  %1108 = vmatpush3.bf16.msra.mxu1 %v1281_v4  ;;  %v1270_v0 = vld [vmem:[%s1713_s3 + $0x1c4] ss:$8 sps:$4 sm:$0xff]   ;;  %v1271_v4 = vld [vmem:[%s1713_s3 + $0x1d0] ss:$8 sps:$4 sm:$0xff]  }
  0x44   :  { %1109 = vmatprep.subr.bf16.mxu1 %v1282_v5 }
  0x46   :  { %759 = vmatpush1.bf16.msra.mxu0 %v1231_v1  ;;  %v1268_v1 = vld [vmem:[%s1713_s3 + $0x1c0] ss:$8 sps:$4 sm:$0xff]  }
  0x47   :  { %769 = vmatprep.subr.bf16.mxu0 %v1234_v2  ;;  %1110 = vmatpush3.bf16.msra.mxu1 %v1283_v6  ;;  %v72_v2 = vsub.s32 2, %v1575_v16  ;;  %v1276_v6 = vld [vmem:[%s1713_s3 + $0x1e4] ss:$8 sps:$4 sm:$0xff]  }
  0x48   :  { %1111 = vmatprep.subr.bf16.mxu1 %v1284_v7  ;;  %v1274_v7 = vld [vmem:[%s1713_s3 + $0x1e0] ss:$8 sps:$4 sm:$0xff]  }
  0x49   :  { %v73_v5 = vrot.slane %v1581_v18, %v72_v2  ;;  %v1295_v18 = vld [vmem:[%s1715_s5 + $0x38] sm:$0xff]  }
  0x4b   :  { %1112 = vmatpush3.bf16.msra.mxu1 %v1285_v8 }
  0x4c   :  { %1113 = vmatprep.subr.bf16.mxu1 %v1286_v9  ;;  %v1279_v9 = vld [vmem:[%s1713_s3 + $0x1f4] ss:$8 sps:$4 sm:$0xff]  }
  0x4f   :  { %1114 = vmatpush3.bf16.msra.mxu1 %v1287_v10  ;;  %v1277_v10 = vld [vmem:[%s1713_s3 + $0x1f0] ss:$8 sps:$4 sm:$0xff]  }
  0x50   :  { %1115 = vmatprep.subr.bf16.mxu1 %v1288_v11 }
  0x53   :  { %1116 = vmatpush3.bf16.msra.mxu1 %v1289_v12 }
  0x54   :  { %1117 = vmatprep.subr.bf16.mxu1 %v1290_v13  ;;  %v1292_v13 = vld [vmem:[%s1715_s5 + $0x70] sm:$0xff]  }
  0x57   :  { %1118 = vmatpush3.bf16.msra.mxu1 %v1291_v14  ;;  %v1293_v14 = vld [vmem:[%s1715_s5 + $0x30] sm:$0xff]  }
  0x58   :  { %1119 = vmatprep.subr.bf16.mxu1 %v1292_v13 }
  0x5b   :  { %1120 = vmatpush3.bf16.msra.mxu1 %v1293_v14 }
  0x5c   :  { %1121 = vmatprep.subr.bf16.mxu1 %v1294_v15 }
  0x5f   :  { %1122 = vmatpush3.bf16.msra.mxu1 %v1295_v18 }
  0xf5   :  { %v276_v22 = vpop.f32.mrb[0].mxu1 }
  0xf6   :  { %v277_v23 = vadd.f32 %v276_v22, %v65_v20  ;;  %v278_v24 = vpop.f32.mrb[1].mxu1  ;;  %v396_v20 = vld [vmem:[%s1717_s4] sm:$0x3] }
  0xf7   :  { %v279_v25 = vadd.f32 %v278_v24, %v69_v21  ;;  %v280_v26 = vpop.f32.mrb[2].mxu1  ;;  %v401_v21 = vrot.slane %v396_v20, %v64_v17  ;;  %v405_v22 = vrot.slane %v396_v20, %v68_v19  ;;  %v1090_v17 = vld [vmem:[%s1718_s6] ss:$0 sm:$0xff] }
  0xf8   :  { %v324_v27 = vmax.f32 %v277_v23, 0.0  ;;  %v281_v28 = vpop.f32.mrb[3].mxu1 }
  0xf9   :  { %v325_v29 = vmax.f32 %v279_v25, 0.0 }
  0xfa   :  { %v328_v32 = vpack.c.bf16 %v324_v27, %v324_v27 }
  0xfb   :  { %v329_v30 = vpack.c.bf16 %v325_v29, %v325_v29 }
  0xfd   :  { %760 = vmatprep.mubr.bf16.mxu0 %v329_v30 }
  0xfe   :  { %761 = vmatmul.mubr.bf16.vlgmr.msra.gmra.mrb[0].mxu0 %v328_v32 }
  0xff   :  { %770 = vmatpush1.bf16.msra.mxu0 %v1232_v31 }
 0x100   :  { %771 = vmatprep.subr.bf16.mxu0 %v1237_v33 }
 0x103   :  { %772 = vmatpush1.bf16.msra.mxu0 %v1235_v34 }
 0x104   :  { %773 = vmatprep.subr.bf16.mxu0 %v1240_v35 }
 0x107   :  { %774 = vmatpush1.bf16.msra.mxu0 %v1238_v36 }
 0x108   :  { %775 = vmatprep.subr.bf16.mxu0 %v1243_v37 }
 0x10b   :  { %776 = vmatpush1.bf16.msra.mxu0 %v1241_v38 }
 0x10c   :  { %777 = vmatprep.subr.bf16.mxu0 %v1246_v39 }
 0x10f   :  { %778 = vmatpush1.bf16.msra.mxu0 %v1244_v40 }
 0x110   :  { %779 = vmatprep.subr.bf16.mxu0 %v1249_v41 }
 0x113   :  { %780 = vmatpush1.bf16.msra.mxu0 %v1247_v42 }
 0x114   :  { %781 = vmatprep.subr.bf16.mxu0 %v1252_v44 }
 0x115   :  { %v317_v48 = vpop.f32.mrb[4].mxu1 }
 0x116   :  { %v319_v49 = vpop.f32.mrb[5].mxu1  ;;  %v318_v8 = vadd.f32 %v317_v48, %v73_v5 }
 0x117   :  { %782 = vmatpush1.bf16.msra.mxu0 %v1250_v45  ;;  %v320_v51 = vadd.f32 %v319_v49, %v77_v46  ;;  %v321_v52 = vpop.f32.mrb[6].mxu1 }
 0x118   :  { %783 = vmatprep.subr.bf16.mxu0 %v1255_v47  ;;  %v322_v54 = vpop.f32.mrb[7].mxu1  ;;  %v326_v11 = vmax.f32 %v318_v8, 0.0 }
 0x119   :  { %v327_v55 = vmax.f32 %v320_v51, 0.0 }
 0x11a   :  { %v330_v12 = vpack.c.bf16 %v326_v11, %v326_v11 }
 0x11b   :  { %784 = vmatpush1.bf16.msra.mxu0 %v1253_v50  ;;  %v331_v57 = vpack.c.bf16 %v327_v55, %v327_v55 }
 0x11c   :  { %785 = vmatprep.subr.bf16.mxu0 %v1258_v53 }
 0x11d   :  { %801 = vmatprep.mubr.bf16.mxu0 %v331_v57 }
 0x11f   :  { %786 = vmatpush1.bf16.msra.mxu0 %v1256_v56 }
 0x120   :  { %787 = vmatprep.subr.bf16.mxu0 %v1261_v58 }
 0x123   :  { %788 = vmatpush1.bf16.msra.mxu0 %v1259_v59 }
 0x124   :  { %789 = vmatprep.subr.bf16.mxu0 %v1264_v60 }
 0x127   :  { %790 = vmatpush1.bf16.msra.mxu0 %v1262_v61 }
 0x128   :  { %791 = vmatprep.subr.bf16.mxu0 %v1267_v62 }
 0x12b   :  { %792 = vmatpush1.bf16.msra.mxu0 %v1265_v63 }
 0x12c   :  { %793 = vmatprep.subr.bf16.mxu0 %v1270_v0 }
 0x12f   :  { %794 = vmatpush1.bf16.msra.mxu0 %v1268_v1 }
 0x130   :  { %795 = vmatprep.subr.bf16.mxu0 %v1273_v3 }
 0x133   :  { %796 = vmatpush1.bf16.msra.mxu0 %v1271_v4 }
 0x134   :  { %797 = vmatprep.subr.bf16.mxu0 %v1276_v6 }
 0x137   :  { %798 = vmatpush1.bf16.msra.mxu0 %v1274_v7 }
 0x138   :  { %799 = vmatprep.subr.bf16.mxu0 %v1279_v9 }
 0x13b   :  { %800 = vmatpush1.bf16.msra.mxu0 %v1277_v10 }
 0x13e   :  { %802 = vmatmul.mubr.bf16.vlgmr.msra.gmra.mrb[0].mxu0 %v330_v12 }
 0x211   :  { %v803_v23 = vpop.f32.mrb[0].mxu0 }
 0x212   :  { %v1129_v24 = vadd.f32 %v803_v23, %v401_v21  ;;  %v805_v25 = vpop.f32.mrb[1].mxu0 }
 0x213   :  { %v1130_v26 = vadd.f32 %v805_v25, %v405_v22  ;;  %v807_v27 = vpop.f32.mrb[2].mxu0 }
 0x214   :  { %v810_v28 = vmax.f32 %v1129_v24, 0.0  ;;  %v808_v29 = vpop.f32.mrb[3].mxu0 }
 0x215   :  { %v811_v30 = vmax.f32 %v1130_v26, 0.0 }
 0x216   :  { %v812_v32 = vpack.c.bf16 %v810_v28, %v810_v28 }
 0x217   :  { %v813_v31 = vpack.c.bf16 %v811_v30, %v811_v30 }
 0x219   :  { %981 = vmatprep.mubr.bf16.mxu1 %v813_v31 }
 0x21a   :  { %982 = vmatmul.mubr.bf16.vlgmr.msra.gmra.mrb[8].mxu1 %v812_v32 }
 0x2ed   :  { %v1123_v33 = vpop.f32.mrb[8].mxu1 }
 0x2ee   :  { %v1124_v34 = vpop.f32.mrb[9].mxu1 }
 0x2ef   :  { %v1125_v16 = vadd.f32 %v1124_v34, %v1123_v33  ;;  %v1126_v19 = vpop.f32.mrb[10].mxu1 }
 0x2f0   :  { %v1127_v35 = vpop.f32.mrb[11].mxu1 }
 0x2f1   :  { %v984_v36 = vadd.f32 %v1125_v16, %v1090_v17 }
 0x2f3   :  { %989 = vst [vmem:[%s1719_s7] sm:$0xff] %v984_v36 }

</bundles_post_ra>
